<compile_context>
chip_gen: v7x
topology: tpu7x:2x2x1
jax: 0.10.0
libtpu: 0.0.40
codegen_flags: <defaults>
</compile_context>

<pallas_src>
import functools

import jax
import jax.numpy as jnp
import numpy as np
from jax.experimental import pallas as pl
from jax.experimental.pallas import tpu as pltpu

_HALO = 128  # lane-aligned halo on each side of the in-kernel shift buffer


def _round_up(v, m):
    return ((v + m - 1) // m) * m


def _resadd_kernel(x_ref, m_ref, w0_ref, w1_ref, w2_ref, b0_ref, b1_ref,
                   b2_ref, o_ref, ext_ref, patch_ref, *, H, W, imgs):
    """One grid step: `imgs` lane-concatenated images, 3 fused convs + ReLUs + add."""
    P = H * W
    G = imgs * P
    rows_max = ext_ref.shape[0]

    # Zero only the two halo bands; the centre is fully rewritten before every
    # conv.  (No pl.when(program_id==0) guard: under megacore sharding the
    # other core would see an unzeroed scratch.)
    zero_band = jnp.zeros((rows_max, _HALO), jnp.float32)
    ext_ref[:, :_HALO] = zero_band
    ext_ref[:, _HALO + G:] = zero_band

    offsets = [(dy, dx) for dy in (-1, 0, 1) for dx in (-1, 0, 1)]

    def conv3x3(rows, w_t, b, relu):
        # ext_ref[:rows, _HALO:_HALO+G] holds the activation: channels on
        # sublanes, (lane-concatenated) spatial on lanes.  Each of the 9 conv
        # taps is a static lane-offset slice of that buffer, masked only where
        # needed, written at its static sublane offset into the persistent
        # patch scratch, then hit with one (C, 9*rows) x (9*rows, G) MXU matmul.
        for t, (dy, dx) in enumerate(offsets):
            off = dy * W + dx
            slab = ext_ref[:rows, _HALO + off:_HALO + off + G]
            # Vertical (dy) padding comes from the zero halo when the step
            # holds a single image; with lane-concatenated images the yy part
            # of the precomputed mask stops cross-image bleed.  The centre tap
            # never needs a mask.
            if (dx != 0) or (imgs > 1 and dy != 0):
                slab = slab * m_ref[t:t + 1, :]
            patch_ref[t * rows:(t + 1) * rows, :] = slab.astype(patch_ref.dtype)
        out = jnp.dot(w_t, patch_ref[:9 * rows, :],
                      preferred_element_type=jnp.float32)
        out = out + b
        if relu:
            out = jnp.maximum(out, 0.0)
        return out                                            # (C_p, G) f32

    cin_rows = x_ref.shape[1]
    c_rows = w1_ref.shape[0]

    # in_layers = Conv3x3 + ReLU (input written per image -> lane concat in VMEM)
    for i in range(imgs):
        ext_ref[:cin_rows, _HALO + i * P:_HALO + (i + 1) * P] = (
            x_ref[i].astype(jnp.float32))
    x_in = conv3x3(cin_rows, w0_ref[...], b0_ref[...], relu=True)

    # layers_a = Conv3x3 + ReLU + Conv3x3
    ext_ref[:c_rows, _HALO:_HALO + G] = x_in
    h = conv3x3(c_rows, w1_ref[...], b1_ref[...], relu=True)

    ext_ref[:c_rows, _HALO:_HALO + G] = h
    x_a = conv3x3(c_rows, w2_ref[...], b2_ref[...], relu=False)

    # layers_b = Identity ; residual add, then per-image lane-dense stores.
    res = (x_a + x_in).astype(o_ref.dtype)
    for i in range(imgs):
        o_ref[i] = res[:, i * P:(i + 1) * P]


def resadd_forward(x_nchw, params, *, images_per_step=None, mxu_bf16=False):
    """Pallas implementation of Resadd.forward (Conv/ReLU/Identity instantiation)."""
    N, Cin, H, W = x_nchw.shape
    C = params["w0"].shape[0]
    P = H * W
    cin_p = _round_up(Cin, 8)
    c_p = _round_up(C, 8)
    rows_max = max(cin_p, c_p)

    # One grid step per TensorCore; images lane-concatenated within a step.
    # v5e/v6e: 1 TC -> a per-image grid is just a serial loop paying ~0.35 us
    # per step, so collapse to one step.  v7x: 2 TCs -> keep parallel steps.
    if images_per_step is None:
        kind = jax.devices()[0].device_kind.lower()
        n_tc = 2 if "v7" in kind else 1
        images_per_step = max(1, -(-N // n_tc))
    images_per_step = min(images_per_step, N)
    steps = -(-N // images_per_step)
    n_pad = steps * images_per_step
    G = images_per_step * P

    # Channels-major, spatial-flattened layout: the long spatial axis sits on
    # lanes.  Zero-padding channels/batch keeps the math exact.
    x = jnp.pad(x_nchw.reshape(N, Cin, P),
                ((0, n_pad - N), (0, cin_p - Cin), (0, 0)))

    # Precompute the 9 tap masks once at trace time (depend only on H, W and
    # images_per_step); they become an XLA constant instead of per-step
    # iota/compare work on the VPU.
    q = np.arange(G) % P
    yy, xx = q // W, q % W
    mask_np = np.zeros((9, G), np.float32)
    for t, (dy, dx) in enumerate([(dy, dx) for dy in (-1, 0, 1)
                                  for dx in (-1, 0, 1)]):
        mask_np[t] = ((yy + dy >= 0) & (yy + dy < H) &
                      (xx + dx >= 0) & (xx + dx < W))
    masks = jnp.asarray(mask_np)

    # MXU input dtype.  f32 keeps the result within 5e-4 of the f32 XLA
    # reference; set mxu_bf16=True on v6e/v7x for more MXU throughput and half
    # the patch-matrix footprint if looser accuracy is acceptable.
    mxu_dtype = jnp.bfloat16 if mxu_bf16 else jnp.float32

    def prep_w(w, cin, cin_pad):
        cout = w.shape[0]
        w = jnp.pad(w, ((0, c_p - cout), (0, cin_pad - cin), (0, 0), (0, 0)))
        # (Cout_p, Cin_p, ky, kx) -> (Cout_p, ky, kx, Cin_p) -> (Cout_p, 9*Cin_p)
        # column index = (ky*3 + kx)*Cin_p + ci, matching the patch-row layout.
        return jnp.transpose(w, (0, 2, 3, 1)).reshape(
            c_p, 9 * cin_pad).astype(mxu_dtype)

    def prep_b(b):
        return jnp.pad(b, (0, c_p - b.shape[0])).reshape(c_p, 1).astype(jnp.float32)

    w0 = prep_w(params["w0"], Cin, cin_p)
    w1 = prep_w(params["w1"], C, c_p)
    w2 = prep_w(params["w2"], C, c_p)
    b0, b1, b2 = prep_b(params["b0"]), prep_b(params["b1"]), prep_b(params["b2"])

    wb = np.dtype(mxu_dtype).itemsize
    flops = 2 * n_pad * P * (9 * cin_p * c_p + 2 * 9 * c_p * c_p)
    bytes_accessed = int(4 * (x.size + masks.size + 3 * c_p + n_pad * c_p * P)
                         + wb * (w0.size + w1.size + w2.size))

    # VMEM headroom check (v7x: 64 MiB physical / 32 MiB scoped default;
    # v5e: 16 MiB scoped default).  Only raise the limit when actually needed
    # so the small case keeps compiler defaults.
    vmem_est = (2 * images_per_step * cin_p * P * 4            # x (dbl-buffered)
                + 2 * images_per_step * c_p * P * 4            # out (dbl-buffered)
                + 2 * 9 * G * 4                                # masks
                + 2 * (9 * cin_p + 18 * c_p) * c_p * wb        # weights
                + 2 * 3 * c_p * 4                              # biases
                + rows_max * (G + 2 * _HALO) * 4               # shift buffer
                + 9 * rows_max * G * wb)                       # patch scratch
    vmem_limit = None
    if vmem_est > (8 << 20):
        vmem_limit = min(2 * vmem_est, 64 * 1024 * 1024)

    kernel = functools.partial(_resadd_kernel, H=H, W=W, imgs=images_per_step)
    out = pl.pallas_call(
        kernel,
        out_shape=jax.ShapeDtypeStruct((n_pad, c_p, P), x_nchw.dtype),
        grid=(steps,),
        in_specs=[
            pl.BlockSpec((images_per_step, cin_p, P), lambda s: (s, 0, 0)),  # x
            pl.BlockSpec((9, G), lambda s: (0, 0)),                          # masks
            pl.BlockSpec((c_p, 9 * cin_p), lambda s: (0, 0)),                # w0^T
            pl.BlockSpec((c_p, 9 * c_p), lambda s: (0, 0)),                  # w1^T
            pl.BlockSpec((c_p, 9 * c_p), lambda s: (0, 0)),                  # w2^T
            pl.BlockSpec((c_p, 1), lambda s: (0, 0)),                        # b0
            pl.BlockSpec((c_p, 1), lambda s: (0, 0)),                        # b1
            pl.BlockSpec((c_p, 1), lambda s: (0, 0)),                        # b2
        ],
        out_specs=pl.BlockSpec((images_per_step, c_p, P), lambda s: (s, 0, 0)),
        scratch_shapes=[
            pltpu.VMEM((rows_max, G + 2 * _HALO), jnp.float32),   # shift buffer
            pltpu.VMEM((9 * rows_max, G), mxu_dtype),             # patch matrix
        ],
        compiler_params=pltpu.CompilerParams(
            dimension_semantics=("parallel",),
            vmem_limit_bytes=vmem_limit),
        cost_estimate=pl.CostEstimate(
            flops=flops, transcendentals=0, bytes_accessed=bytes_accessed),
    )(x, masks, w0, w1, w2, b0, b1, b2)

    return out[:N, :C, :].reshape(N, C, H, W)


# ------------------------------ pure-JAX reference -------------------------

def _conv_ref(x_nchw, w_oihw, bias):
    y = jax.lax.conv_general_dilated(
        x_nchw, w_oihw, window_strides=(1, 1), padding=((1, 1), (1, 1)),
        dimension_numbers=("NCHW", "OIHW", "NCHW"),
        precision=jax.lax.Precision.HIGHEST)
    return y + bias.reshape(1, -1, 1, 1)


def resadd_ref(x_nchw, params):
    x_in = jax.nn.relu(_conv_ref(x_nchw, params["w0"], params["b0"]))
    x_a = _conv_ref(jax.nn.relu(_conv_ref(x_in, params["w1"], params["b1"])),
                    params["w2"], params["b2"])
    return x_a + x_in                                        # layers_b = Identity


# ----------------------------------- main ----------------------------------

if __name__ == "__main__":
    key = jax.random.PRNGKey(0)
    k_x, k0, k1, k2, kb0, kb1, kb2 = jax.random.split(key, 7)

    N, Cin, H, W = 2, 4, 16, 16
    C = 8

    x = jax.random.normal(k_x, (N, Cin, H, W), dtype=jnp.float32)

    params = {
        "w0": 0.1 * jax.random.normal(k0, (C, Cin, 3, 3), dtype=jnp.float32),
        "b0": 0.1 * jax.random.normal(kb0, (C,), dtype=jnp.float32),
        "w1": 0.1 * jax.random.normal(k1, (C, C, 3, 3), dtype=jnp.float32),
        "b1": 0.1 * jax.random.normal(kb1, (C,), dtype=jnp.float32),
        "w2": 0.1 * jax.random.normal(k2, (C, C, 3, 3), dtype=jnp.float32),
        "b2": 0.1 * jax.random.normal(kb2, (C,), dtype=jnp.float32),
    }

    out = jax.jit(resadd_forward)(x, params)
    out = jax.block_until_ready(out)

    ref = resadd_ref(x, params)
    assert out.shape == (N, C, H, W)
    max_err = jnp.max(jnp.abs(out - ref))
    assert jnp.allclose(out, ref, atol=5e-4, rtol=5e-4), (
        f"mismatch vs reference (max abs err {max_err})")

    print("KERNEL_OK")
</pallas_src>

<mosaic_0001>
module attributes {stable_mosaic.version = 11 : i64} {
  func.func @_resadd_kernel(%arg0: i32, %arg1: memref<2x8x256xf32, #tpu.memory_space<vmem>>, %arg2: memref<9x512xf32, #tpu.memory_space<vmem>>, %arg3: memref<8x72xf32, #tpu.memory_space<vmem>>, %arg4: memref<8x72xf32, #tpu.memory_space<vmem>>, %arg5: memref<8x72xf32, #tpu.memory_space<vmem>>, %arg6: memref<8x1xf32, #tpu.memory_space<vmem>>, %arg7: memref<8x1xf32, #tpu.memory_space<vmem>>, %arg8: memref<8x1xf32, #tpu.memory_space<vmem>>, %arg9: memref<2x8x256xf32, #tpu.memory_space<vmem>>, %arg10: memref<8x768xf32, #tpu.memory_space<vmem>>, %arg11: memref<72x512xf32, #tpu.memory_space<vmem>>) attributes {dimension_semantics = [#tpu.dimension_semantics<parallel>], iteration_bounds = array<i64: 1>, scalar_prefetch = 0 : i64, scratch_operands = 2 : i64, tpu.core_type = #tpu.core_type<tc>, window_params = [{transform_indices = @transform_0, window_bounds = array<i64: 2, 8, 256>}, {pipeline_mode = #tpu.pipeline_mode<synchronous>, transform_indices = @transform_1, window_bounds = array<i64: 9, 512>}, {pipeline_mode = #tpu.pipeline_mode<synchronous>, transform_indices = @transform_2, window_bounds = array<i64: 8, 72>}, {pipeline_mode = #tpu.pipeline_mode<synchronous>, transform_indices = @transform_3, window_bounds = array<i64: 8, 72>}, {pipeline_mode = #tpu.pipeline_mode<synchronous>, transform_indices = @transform_4, window_bounds = array<i64: 8, 72>}, {pipeline_mode = #tpu.pipeline_mode<synchronous>, transform_indices = @transform_5, window_bounds = array<i64: 8, 1>}, {pipeline_mode = #tpu.pipeline_mode<synchronous>, transform_indices = @transform_6, window_bounds = array<i64: 8, 1>}, {pipeline_mode = #tpu.pipeline_mode<synchronous>, transform_indices = @transform_7, window_bounds = array<i64: 8, 1>}, {transform_indices = @transform_8, window_bounds = array<i64: 2, 8, 256>}]} {
    %cst = arith.constant 0.000000e+00 : f32
    %0 = vector.broadcast %cst : f32 to vector<8x128xf32>
    %c0 = arith.constant 0 : index
    %c0_0 = arith.constant 0 : index
    %1 = vector.load %arg10[%c0, %c0_0] : memref<8x768xf32, #tpu.memory_space<vmem>>, vector<8x128xf32>
    tpu.vector_store %arg10[%c0, %c0_0], %0 {strides = array<i32>} : memref<8x768xf32, #tpu.memory_space<vmem>>, vector<8x128xf32>,
    %c0_1 = arith.constant 0 : index
    %c640 = arith.constant 640 : index
    %2 = vector.load %arg10[%c0_1, %c640] : memref<8x768xf32, #tpu.memory_space<vmem>>, vector<8x128xf32>
    tpu.vector_store %arg10[%c0_1, %c640], %0 {strides = array<i32>} : memref<8x768xf32, #tpu.memory_space<vmem>>, vector<8x128xf32>,
    %c0_2 = arith.constant 0 : index
    %c0_3 = arith.constant 0 : index
    %c0_4 = arith.constant 0 : index
    %3 = vector.load %arg1[%c0_2, %c0_3, %c0_4] : memref<2x8x256xf32, #tpu.memory_space<vmem>>, vector<1x8x256xf32>
    %4 = vector.shape_cast %3 : vector<1x8x256xf32> to vector<8x256xf32>
    %c0_5 = arith.constant 0 : index
    %c128 = arith.constant 128 : index
    %5 = vector.load %arg10[%c0_5, %c128] : memref<8x768xf32, #tpu.memory_space<vmem>>, vector<8x256xf32>
    tpu.vector_store %arg10[%c0_5, %c128], %4 {strides = array<i32>} : memref<8x768xf32, #tpu.memory_space<vmem>>, vector<8x256xf32>,
    %c1 = arith.constant 1 : index
    %c0_6 = arith.constant 0 : index
    %c0_7 = arith.constant 0 : index
    %6 = vector.load %arg1[%c1, %c0_6, %c0_7] : memref<2x8x256xf32, #tpu.memory_space<vmem>>, vector<1x8x256xf32>
    %7 = vector.shape_cast %6 : vector<1x8x256xf32> to vector<8x256xf32>
    %c0_8 = arith.constant 0 : index
    %c384 = arith.constant 384 : index
    %8 = vector.load %arg10[%c0_8, %c384] : memref<8x768xf32, #tpu.memory_space<vmem>>, vector<8x256xf32>
    tpu.vector_store %arg10[%c0_8, %c384], %7 {strides = array<i32>} : memref<8x768xf32, #tpu.memory_space<vmem>>, vector<8x256xf32>,
    %c0_9 = arith.constant 0 : index
    %c0_10 = arith.constant 0 : index
    %9 = vector.load %arg3[%c0_9, %c0_10] : memref<8x72xf32, #tpu.memory_space<vmem>>, vector<8x72xf32>
    %c0_11 = arith.constant 0 : index
    %c0_12 = arith.constant 0 : index
    %10 = vector.load %arg6[%c0_11, %c0_12] : memref<8x1xf32, #tpu.memory_space<vmem>>, vector<8x1xf32>
    %c0_13 = arith.constant 0 : index
    %c111 = arith.constant 111 : index
    %11 = vector.load %arg10[%c0_13, %c111] : memref<8x768xf32, #tpu.memory_space<vmem>>, vector<8x512xf32>
    %c0_14 = arith.constant 0 : index
    %c0_15 = arith.constant 0 : index
    %12 = vector.load %arg2[%c0_14, %c0_15] : memref<9x512xf32, #tpu.memory_space<vmem>>, vector<1x512xf32>
    %13 = vector.broadcast %12 : vector<1x512xf32> to vector<8x512xf32>
    %14 = arith.mulf %11, %13 : vector<8x512xf32>
    %c0_16 = arith.constant 0 : index
    %c0_17 = arith.constant 0 : index
    %15 = vector.load %arg11[%c0_16, %c0_17] : memref<72x512xf32, #tpu.memory_space<vmem>>, vector<8x512xf32>
    tpu.vector_store %arg11[%c0_16, %c0_17], %14 {strides = array<i32>} : memref<72x512xf32, #tpu.memory_space<vmem>>, vector<8x512xf32>,
    %c0_18 = arith.constant 0 : index
    %c112 = arith.constant 112 : index
    %16 = vector.load %arg10[%c0_18, %c112] : memref<8x768xf32, #tpu.memory_space<vmem>>, vector<8x512xf32>
    %c1_19 = arith.constant 1 : index
    %c0_20 = arith.constant 0 : index
    %17 = vector.load %arg2[%c1_19, %c0_20] : memref<9x512xf32, #tpu.memory_space<vmem>>, vector<1x512xf32>
    %18 = vector.broadcast %17 : vector<1x512xf32> to vector<8x512xf32>
    %19 = arith.mulf %16, %18 : vector<8x512xf32>
    %c8 = arith.constant 8 : index
    %c0_21 = arith.constant 0 : index
    %20 = vector.load %arg11[%c8, %c0_21] : memref<72x512xf32, #tpu.memory_space<vmem>>, vector<8x512xf32>
    tpu.vector_store %arg11[%c8, %c0_21], %19 {strides = array<i32>} : memref<72x512xf32, #tpu.memory_space<vmem>>, vector<8x512xf32>,
    %c0_22 = arith.constant 0 : index
    %c113 = arith.constant 113 : index
    %21 = vector.load %arg10[%c0_22, %c113] : memref<8x768xf32, #tpu.memory_space<vmem>>, vector<8x512xf32>
    %c2 = arith.constant 2 : index
    %c0_23 = arith.constant 0 : index
    %22 = vector.load %arg2[%c2, %c0_23] : memref<9x512xf32, #tpu.memory_space<vmem>>, vector<1x512xf32>
    %23 = vector.broadcast %22 : vector<1x512xf32> to vector<8x512xf32>
    %24 = arith.mulf %21, %23 : vector<8x512xf32>
    %c16 = arith.constant 16 : index
    %c0_24 = arith.constant 0 : index
    %25 = vector.load %arg11[%c16, %c0_24] : memref<72x512xf32, #tpu.memory_space<vmem>>, vector<8x512xf32>
    tpu.vector_store %arg11[%c16, %c0_24], %24 {strides = array<i32>} : memref<72x512xf32, #tpu.memory_space<vmem>>, vector<8x512xf32>,
    %c0_25 = arith.constant 0 : index
    %c127 = arith.constant 127 : index
    %26 = vector.load %arg10[%c0_25, %c127] : memref<8x768xf32, #tpu.memory_space<vmem>>, vector<8x512xf32>
    %c3 = arith.constant 3 : index
    %c0_26 = arith.constant 0 : index
    %27 = vector.load %arg2[%c3, %c0_26] : memref<9x512xf32, #tpu.memory_space<vmem>>, vector<1x512xf32>
    %28 = vector.broadcast %27 : vector<1x512xf32> to vector<8x512xf32>
    %29 = arith.mulf %26, %28 : vector<8x512xf32>
    %c24 = arith.constant 24 : index
    %c0_27 = arith.constant 0 : index
    %30 = vector.load %arg11[%c24, %c0_27] : memref<72x512xf32, #tpu.memory_space<vmem>>, vector<8x512xf32>
    tpu.vector_store %arg11[%c24, %c0_27], %29 {strides = array<i32>} : memref<72x512xf32, #tpu.memory_space<vmem>>, vector<8x512xf32>,
    %c0_28 = arith.constant 0 : index
    %c128_29 = arith.constant 128 : index
    %31 = vector.load %arg10[%c0_28, %c128_29] : memref<8x768xf32, #tpu.memory_space<vmem>>, vector<8x512xf32>
    %c32 = arith.constant 32 : index
    %c0_30 = arith.constant 0 : index
    %32 = vector.load %arg11[%c32, %c0_30] : memref<72x512xf32, #tpu.memory_space<vmem>>, vector<8x512xf32>
    tpu.vector_store %arg11[%c32, %c0_30], %31 {strides = array<i32>} : memref<72x512xf32, #tpu.memory_space<vmem>>, vector<8x512xf32>,
    %c0_31 = arith.constant 0 : index
    %c129 = arith.constant 129 : index
    %33 = vector.load %arg10[%c0_31, %c129] : memref<8x768xf32, #tpu.memory_space<vmem>>, vector<8x512xf32>
    %c5 = arith.constant 5 : index
    %c0_32 = arith.constant 0 : index
    %34 = vector.load %arg2[%c5, %c0_32] : memref<9x512xf32, #tpu.memory_space<vmem>>, vector<1x512xf32>
    %35 = vector.broadcast %34 : vector<1x512xf32> to vector<8x512xf32>
    %36 = arith.mulf %33, %35 : vector<8x512xf32>
    %c40 = arith.constant 40 : index
    %c0_33 = arith.constant 0 : index
    %37 = vector.load %arg11[%c40, %c0_33] : memref<72x512xf32, #tpu.memory_space<vmem>>, vector<8x512xf32>
    tpu.vector_store %arg11[%c40, %c0_33], %36 {strides = array<i32>} : memref<72x512xf32, #tpu.memory_space<vmem>>, vector<8x512xf32>,
    %c0_34 = arith.constant 0 : index
    %c143 = arith.constant 143 : index
    %38 = vector.load %arg10[%c0_34, %c143] : memref<8x768xf32, #tpu.memory_space<vmem>>, vector<8x512xf32>
    %c6 = arith.constant 6 : index
    %c0_35 = arith.constant 0 : index
    %39 = vector.load %arg2[%c6, %c0_35] : memref<9x512xf32, #tpu.memory_space<vmem>>, vector<1x512xf32>
    %40 = vector.broadcast %39 : vector<1x512xf32> to vector<8x512xf32>
    %41 = arith.mulf %38, %40 : vector<8x512xf32>
    %c48 = arith.constant 48 : index
    %c0_36 = arith.constant 0 : index
    %42 = vector.load %arg11[%c48, %c0_36] : memref<72x512xf32, #tpu.memory_space<vmem>>, vector<8x512xf32>
    tpu.vector_store %arg11[%c48, %c0_36], %41 {strides = array<i32>} : memref<72x512xf32, #tpu.memory_space<vmem>>, vector<8x512xf32>,
    %c0_37 = arith.constant 0 : index
    %c144 = arith.constant 144 : index
    %43 = vector.load %arg10[%c0_37, %c144] : memref<8x768xf32, #tpu.memory_space<vmem>>, vector<8x512xf32>
    %c7 = arith.constant 7 : index
    %c0_38 = arith.constant 0 : index
    %44 = vector.load %arg2[%c7, %c0_38] : memref<9x512xf32, #tpu.memory_space<vmem>>, vector<1x512xf32>
    %45 = vector.broadcast %44 : vector<1x512xf32> to vector<8x512xf32>
    %46 = arith.mulf %43, %45 : vector<8x512xf32>
    %c56 = arith.constant 56 : index
    %c0_39 = arith.constant 0 : index
    %47 = vector.load %arg11[%c56, %c0_39] : memref<72x512xf32, #tpu.memory_space<vmem>>, vector<8x512xf32>
    tpu.vector_store %arg11[%c56, %c0_39], %46 {strides = array<i32>} : memref<72x512xf32, #tpu.memory_space<vmem>>, vector<8x512xf32>,
    %c0_40 = arith.constant 0 : index
    %c145 = arith.constant 145 : index
    %48 = vector.load %arg10[%c0_40, %c145] : memref<8x768xf32, #tpu.memory_space<vmem>>, vector<8x512xf32>
    %c8_41 = arith.constant 8 : index
    %c0_42 = arith.constant 0 : index
    %49 = vector.load %arg2[%c8_41, %c0_42] : memref<9x512xf32, #tpu.memory_space<vmem>>, vector<1x512xf32>
    %50 = vector.broadcast %49 : vector<1x512xf32> to vector<8x512xf32>
    %51 = arith.mulf %48, %50 : vector<8x512xf32>
    %c64 = arith.constant 64 : index
    %c0_43 = arith.constant 0 : index
    %52 = vector.load %arg11[%c64, %c0_43] : memref<72x512xf32, #tpu.memory_space<vmem>>, vector<8x512xf32>
    tpu.vector_store %arg11[%c64, %c0_43], %51 {strides = array<i32>} : memref<72x512xf32, #tpu.memory_space<vmem>>, vector<8x512xf32>,
    %c0_44 = arith.constant 0 : index
    %c0_45 = arith.constant 0 : index
    %53 = vector.load %arg11[%c0_44, %c0_45] : memref<72x512xf32, #tpu.memory_space<vmem>>, vector<72x512xf32>
    %cst_46 = arith.constant dense<0.000000e+00> : vector<8x512xf32>
    %54 = tpu.matmul %9, %53, %cst_46 {dimension_numbers = #tpu.dot_dimension_numbers<[1], [0], [0], [1], [0, 0, 1, 1], [], []>} : vector<8x72xf32>, vector<72x512xf32>, vector<8x512xf32> -> vector<8x512xf32>
    %55 = vector.broadcast %10 : vector<8x1xf32> to vector<8x512xf32>
    %56 = arith.addf %54, %55 : vector<8x512xf32>
    %cst_47 = arith.constant 0.000000e+00 : f32
    %57 = vector.broadcast %cst_47 : f32 to vector<8x512xf32>
    %58 = arith.maximumf %56, %57 : vector<8x512xf32>
    %c0_48 = arith.constant 0 : index
    %c128_49 = arith.constant 128 : index
    %59 = vector.load %arg10[%c0_48, %c128_49] : memref<8x768xf32, #tpu.memory_space<vmem>>, vector<8x512xf32>
    tpu.vector_store %arg10[%c0_48, %c128_49], %58 {strides = array<i32>} : memref<8x768xf32, #tpu.memory_space<vmem>>, vector<8x512xf32>,
    %c0_50 = arith.constant 0 : index
    %c0_51 = arith.constant 0 : index
    %60 = vector.load %arg4[%c0_50, %c0_51] : memref<8x72xf32, #tpu.memory_space<vmem>>, vector<8x72xf32>
    %c0_52 = arith.constant 0 : index
    %c0_53 = arith.constant 0 : index
    %61 = vector.load %arg7[%c0_52, %c0_53] : memref<8x1xf32, #tpu.memory_space<vmem>>, vector<8x1xf32>
    %c0_54 = arith.constant 0 : index
    %c111_55 = arith.constant 111 : index
    %62 = vector.load %arg10[%c0_54, %c111_55] : memref<8x768xf32, #tpu.memory_space<vmem>>, vector<8x512xf32>
    %c0_56 = arith.constant 0 : index
    %c0_57 = arith.constant 0 : index
    %63 = vector.load %arg2[%c0_56, %c0_57] : memref<9x512xf32, #tpu.memory_space<vmem>>, vector<1x512xf32>
    %64 = vector.broadcast %63 : vector<1x512xf32> to vector<8x512xf32>
    %65 = arith.mulf %62, %64 : vector<8x512xf32>
    %c0_58 = arith.constant 0 : index
    %c0_59 = arith.constant 0 : index
    %66 = vector.load %arg11[%c0_58, %c0_59] : memref<72x512xf32, #tpu.memory_space<vmem>>, vector<8x512xf32>
    tpu.vector_store %arg11[%c0_58, %c0_59], %65 {strides = array<i32>} : memref<72x512xf32, #tpu.memory_space<vmem>>, vector<8x512xf32>,
    %c0_60 = arith.constant 0 : index
    %c112_61 = arith.constant 112 : index
    %67 = vector.load %arg10[%c0_60, %c112_61] : memref<8x768xf32, #tpu.memory_space<vmem>>, vector<8x512xf32>
    %c1_62 = arith.constant 1 : index
    %c0_63 = arith.constant 0 : index
    %68 = vector.load %arg2[%c1_62, %c0_63] : memref<9x512xf32, #tpu.memory_space<vmem>>, vector<1x512xf32>
    %69 = vector.broadcast %68 : vector<1x512xf32> to vector<8x512xf32>
    %70 = arith.mulf %67, %69 : vector<8x512xf32>
    %c8_64 = arith.constant 8 : index
    %c0_65 = arith.constant 0 : index
    %71 = vector.load %arg11[%c8_64, %c0_65] : memref<72x512xf32, #tpu.memory_space<vmem>>, vector<8x512xf32>
    tpu.vector_store %arg11[%c8_64, %c0_65], %70 {strides = array<i32>} : memref<72x512xf32, #tpu.memory_space<vmem>>, vector<8x512xf32>,
    %c0_66 = arith.constant 0 : index
    %c113_67 = arith.constant 113 : index
    %72 = vector.load %arg10[%c0_66, %c113_67] : memref<8x768xf32, #tpu.memory_space<vmem>>, vector<8x512xf32>
    %c2_68 = arith.constant 2 : index
    %c0_69 = arith.constant 0 : index
    %73 = vector.load %arg2[%c2_68, %c0_69] : memref<9x512xf32, #tpu.memory_space<vmem>>, vector<1x512xf32>
    %74 = vector.broadcast %73 : vector<1x512xf32> to vector<8x512xf32>
    %75 = arith.mulf %72, %74 : vector<8x512xf32>
    %c16_70 = arith.constant 16 : index
    %c0_71 = arith.constant 0 : index
    %76 = vector.load %arg11[%c16_70, %c0_71] : memref<72x512xf32, #tpu.memory_space<vmem>>, vector<8x512xf32>
    tpu.vector_store %arg11[%c16_70, %c0_71], %75 {strides = array<i32>} : memref<72x512xf32, #tpu.memory_space<vmem>>, vector<8x512xf32>,
    %c0_72 = arith.constant 0 : index
    %c127_73 = arith.constant 127 : index
    %77 = vector.load %arg10[%c0_72, %c127_73] : memref<8x768xf32, #tpu.memory_space<vmem>>, vector<8x512xf32>
    %c3_74 = arith.constant 3 : index
    %c0_75 = arith.constant 0 : index
    %78 = vector.load %arg2[%c3_74, %c0_75] : memref<9x512xf32, #tpu.memory_space<vmem>>, vector<1x512xf32>
    %79 = vector.broadcast %78 : vector<1x512xf32> to vector<8x512xf32>
    %80 = arith.mulf %77, %79 : vector<8x512xf32>
    %c24_76 = arith.constant 24 : index
    %c0_77 = arith.constant 0 : index
    %81 = vector.load %arg11[%c24_76, %c0_77] : memref<72x512xf32, #tpu.memory_space<vmem>>, vector<8x512xf32>
    tpu.vector_store %arg11[%c24_76, %c0_77], %80 {strides = array<i32>} : memref<72x512xf32, #tpu.memory_space<vmem>>, vector<8x512xf32>,
    %c0_78 = arith.constant 0 : index
    %c128_79 = arith.constant 128 : index
    %82 = vector.load %arg10[%c0_78, %c128_79] : memref<8x768xf32, #tpu.memory_space<vmem>>, vector<8x512xf32>
    %c32_80 = arith.constant 32 : index
    %c0_81 = arith.constant 0 : index
    %83 = vector.load %arg11[%c32_80, %c0_81] : memref<72x512xf32, #tpu.memory_space<vmem>>, vector<8x512xf32>
    tpu.vector_store %arg11[%c32_80, %c0_81], %82 {strides = array<i32>} : memref<72x512xf32, #tpu.memory_space<vmem>>, vector<8x512xf32>,
    %c0_82 = arith.constant 0 : index
    %c129_83 = arith.constant 129 : index
    %84 = vector.load %arg10[%c0_82, %c129_83] : memref<8x768xf32, #tpu.memory_space<vmem>>, vector<8x512xf32>
    %c5_84 = arith.constant 5 : index
    %c0_85 = arith.constant 0 : index
    %85 = vector.load %arg2[%c5_84, %c0_85] : memref<9x512xf32, #tpu.memory_space<vmem>>, vector<1x512xf32>
    %86 = vector.broadcast %85 : vector<1x512xf32> to vector<8x512xf32>
    %87 = arith.mulf %84, %86 : vector<8x512xf32>
    %c40_86 = arith.constant 40 : index
    %c0_87 = arith.constant 0 : index
    %88 = vector.load %arg11[%c40_86, %c0_87] : memref<72x512xf32, #tpu.memory_space<vmem>>, vector<8x512xf32>
    tpu.vector_store %arg11[%c40_86, %c0_87], %87 {strides = array<i32>} : memref<72x512xf32, #tpu.memory_space<vmem>>, vector<8x512xf32>,
    %c0_88 = arith.constant 0 : index
    %c143_89 = arith.constant 143 : index
    %89 = vector.load %arg10[%c0_88, %c143_89] : memref<8x768xf32, #tpu.memory_space<vmem>>, vector<8x512xf32>
    %c6_90 = arith.constant 6 : index
    %c0_91 = arith.constant 0 : index
    %90 = vector.load %arg2[%c6_90, %c0_91] : memref<9x512xf32, #tpu.memory_space<vmem>>, vector<1x512xf32>
    %91 = vector.broadcast %90 : vector<1x512xf32> to vector<8x512xf32>
    %92 = arith.mulf %89, %91 : vector<8x512xf32>
    %c48_92 = arith.constant 48 : index
    %c0_93 = arith.constant 0 : index
    %93 = vector.load %arg11[%c48_92, %c0_93] : memref<72x512xf32, #tpu.memory_space<vmem>>, vector<8x512xf32>
    tpu.vector_store %arg11[%c48_92, %c0_93], %92 {strides = array<i32>} : memref<72x512xf32, #tpu.memory_space<vmem>>, vector<8x512xf32>,
    %c0_94 = arith.constant 0 : index
    %c144_95 = arith.constant 144 : index
    %94 = vector.load %arg10[%c0_94, %c144_95] : memref<8x768xf32, #tpu.memory_space<vmem>>, vector<8x512xf32>
    %c7_96 = arith.constant 7 : index
    %c0_97 = arith.constant 0 : index
    %95 = vector.load %arg2[%c7_96, %c0_97] : memref<9x512xf32, #tpu.memory_space<vmem>>, vector<1x512xf32>
    %96 = vector.broadcast %95 : vector<1x512xf32> to vector<8x512xf32>
    %97 = arith.mulf %94, %96 : vector<8x512xf32>
    %c56_98 = arith.constant 56 : index
    %c0_99 = arith.constant 0 : index
    %98 = vector.load %arg11[%c56_98, %c0_99] : memref<72x512xf32, #tpu.memory_space<vmem>>, vector<8x512xf32>
    tpu.vector_store %arg11[%c56_98, %c0_99], %97 {strides = array<i32>} : memref<72x512xf32, #tpu.memory_space<vmem>>, vector<8x512xf32>,
    %c0_100 = arith.constant 0 : index
    %c145_101 = arith.constant 145 : index
    %99 = vector.load %arg10[%c0_100, %c145_101] : memref<8x768xf32, #tpu.memory_space<vmem>>, vector<8x512xf32>
    %c8_102 = arith.constant 8 : index
    %c0_103 = arith.constant 0 : index
    %100 = vector.load %arg2[%c8_102, %c0_103] : memref<9x512xf32, #tpu.memory_space<vmem>>, vector<1x512xf32>
    %101 = vector.broadcast %100 : vector<1x512xf32> to vector<8x512xf32>
    %102 = arith.mulf %99, %101 : vector<8x512xf32>
    %c64_104 = arith.constant 64 : index
    %c0_105 = arith.constant 0 : index
    %103 = vector.load %arg11[%c64_104, %c0_105] : memref<72x512xf32, #tpu.memory_space<vmem>>, vector<8x512xf32>
    tpu.vector_store %arg11[%c64_104, %c0_105], %102 {strides = array<i32>} : memref<72x512xf32, #tpu.memory_space<vmem>>, vector<8x512xf32>,
    %c0_106 = arith.constant 0 : index
    %c0_107 = arith.constant 0 : index
    %104 = vector.load %arg11[%c0_106, %c0_107] : memref<72x512xf32, #tpu.memory_space<vmem>>, vector<72x512xf32>
    %cst_108 = arith.constant dense<0.000000e+00> : vector<8x512xf32>
    %105 = tpu.matmul %60, %104, %cst_108 {dimension_numbers = #tpu.dot_dimension_numbers<[1], [0], [0], [1], [0, 0, 1, 1], [], []>} : vector<8x72xf32>, vector<72x512xf32>, vector<8x512xf32> -> vector<8x512xf32>
    %106 = vector.broadcast %61 : vector<8x1xf32> to vector<8x512xf32>
    %107 = arith.addf %105, %106 : vector<8x512xf32>
    %cst_109 = arith.constant 0.000000e+00 : f32
    %108 = vector.broadcast %cst_109 : f32 to vector<8x512xf32>
    %109 = arith.maximumf %107, %108 : vector<8x512xf32>
    %c0_110 = arith.constant 0 : index
    %c128_111 = arith.constant 128 : index
    %110 = vector.load %arg10[%c0_110, %c128_111] : memref<8x768xf32, #tpu.memory_space<vmem>>, vector<8x512xf32>
    tpu.vector_store %arg10[%c0_110, %c128_111], %109 {strides = array<i32>} : memref<8x768xf32, #tpu.memory_space<vmem>>, vector<8x512xf32>,
    %c0_112 = arith.constant 0 : index
    %c0_113 = arith.constant 0 : index
    %111 = vector.load %arg5[%c0_112, %c0_113] : memref<8x72xf32, #tpu.memory_space<vmem>>, vector<8x72xf32>
    %c0_114 = arith.constant 0 : index
    %c0_115 = arith.constant 0 : index
    %112 = vector.load %arg8[%c0_114, %c0_115] : memref<8x1xf32, #tpu.memory_space<vmem>>, vector<8x1xf32>
    %c0_116 = arith.constant 0 : index
    %c111_117 = arith.constant 111 : index
    %113 = vector.load %arg10[%c0_116, %c111_117] : memref<8x768xf32, #tpu.memory_space<vmem>>, vector<8x512xf32>
    %c0_118 = arith.constant 0 : index
    %c0_119 = arith.constant 0 : index
    %114 = vector.load %arg2[%c0_118, %c0_119] : memref<9x512xf32, #tpu.memory_space<vmem>>, vector<1x512xf32>
    %115 = vector.broadcast %114 : vector<1x512xf32> to vector<8x512xf32>
    %116 = arith.mulf %113, %115 : vector<8x512xf32>
    %c0_120 = arith.constant 0 : index
    %c0_121 = arith.constant 0 : index
    %117 = vector.load %arg11[%c0_120, %c0_121] : memref<72x512xf32, #tpu.memory_space<vmem>>, vector<8x512xf32>
    tpu.vector_store %arg11[%c0_120, %c0_121], %116 {strides = array<i32>} : memref<72x512xf32, #tpu.memory_space<vmem>>, vector<8x512xf32>,
    %c0_122 = arith.constant 0 : index
    %c112_123 = arith.constant 112 : index
    %118 = vector.load %arg10[%c0_122, %c112_123] : memref<8x768xf32, #tpu.memory_space<vmem>>, vector<8x512xf32>
    %c1_124 = arith.constant 1 : index
    %c0_125 = arith.constant 0 : index
    %119 = vector.load %arg2[%c1_124, %c0_125] : memref<9x512xf32, #tpu.memory_space<vmem>>, vector<1x512xf32>
    %120 = vector.broadcast %119 : vector<1x512xf32> to vector<8x512xf32>
    %121 = arith.mulf %118, %120 : vector<8x512xf32>
    %c8_126 = arith.constant 8 : index
    %c0_127 = arith.constant 0 : index
    %122 = vector.load %arg11[%c8_126, %c0_127] : memref<72x512xf32, #tpu.memory_space<vmem>>, vector<8x512xf32>
    tpu.vector_store %arg11[%c8_126, %c0_127], %121 {strides = array<i32>} : memref<72x512xf32, #tpu.memory_space<vmem>>, vector<8x512xf32>,
    %c0_128 = arith.constant 0 : index
    %c113_129 = arith.constant 113 : index
    %123 = vector.load %arg10[%c0_128, %c113_129] : memref<8x768xf32, #tpu.memory_space<vmem>>, vector<8x512xf32>
    %c2_130 = arith.constant 2 : index
    %c0_131 = arith.constant 0 : index
    %124 = vector.load %arg2[%c2_130, %c0_131] : memref<9x512xf32, #tpu.memory_space<vmem>>, vector<1x512xf32>
    %125 = vector.broadcast %124 : vector<1x512xf32> to vector<8x512xf32>
    %126 = arith.mulf %123, %125 : vector<8x512xf32>
    %c16_132 = arith.constant 16 : index
    %c0_133 = arith.constant 0 : index
    %127 = vector.load %arg11[%c16_132, %c0_133] : memref<72x512xf32, #tpu.memory_space<vmem>>, vector<8x512xf32>
    tpu.vector_store %arg11[%c16_132, %c0_133], %126 {strides = array<i32>} : memref<72x512xf32, #tpu.memory_space<vmem>>, vector<8x512xf32>,
    %c0_134 = arith.constant 0 : index
    %c127_135 = arith.constant 127 : index
    %128 = vector.load %arg10[%c0_134, %c127_135] : memref<8x768xf32, #tpu.memory_space<vmem>>, vector<8x512xf32>
    %c3_136 = arith.constant 3 : index
    %c0_137 = arith.constant 0 : index
    %129 = vector.load %arg2[%c3_136, %c0_137] : memref<9x512xf32, #tpu.memory_space<vmem>>, vector<1x512xf32>
    %130 = vector.broadcast %129 : vector<1x512xf32> to vector<8x512xf32>
    %131 = arith.mulf %128, %130 : vector<8x512xf32>
    %c24_138 = arith.constant 24 : index
    %c0_139 = arith.constant 0 : index
    %132 = vector.load %arg11[%c24_138, %c0_139] : memref<72x512xf32, #tpu.memory_space<vmem>>, vector<8x512xf32>
    tpu.vector_store %arg11[%c24_138, %c0_139], %131 {strides = array<i32>} : memref<72x512xf32, #tpu.memory_space<vmem>>, vector<8x512xf32>,
    %c0_140 = arith.constant 0 : index
    %c128_141 = arith.constant 128 : index
    %133 = vector.load %arg10[%c0_140, %c128_141] : memref<8x768xf32, #tpu.memory_space<vmem>>, vector<8x512xf32>
    %c32_142 = arith.constant 32 : index
    %c0_143 = arith.constant 0 : index
    %134 = vector.load %arg11[%c32_142, %c0_143] : memref<72x512xf32, #tpu.memory_space<vmem>>, vector<8x512xf32>
    tpu.vector_store %arg11[%c32_142, %c0_143], %133 {strides = array<i32>} : memref<72x512xf32, #tpu.memory_space<vmem>>, vector<8x512xf32>,
    %c0_144 = arith.constant 0 : index
    %c129_145 = arith.constant 129 : index
    %135 = vector.load %arg10[%c0_144, %c129_145] : memref<8x768xf32, #tpu.memory_space<vmem>>, vector<8x512xf32>
    %c5_146 = arith.constant 5 : index
    %c0_147 = arith.constant 0 : index
    %136 = vector.load %arg2[%c5_146, %c0_147] : memref<9x512xf32, #tpu.memory_space<vmem>>, vector<1x512xf32>
    %137 = vector.broadcast %136 : vector<1x512xf32> to vector<8x512xf32>
    %138 = arith.mulf %135, %137 : vector<8x512xf32>
    %c40_148 = arith.constant 40 : index
    %c0_149 = arith.constant 0 : index
    %139 = vector.load %arg11[%c40_148, %c0_149] : memref<72x512xf32, #tpu.memory_space<vmem>>, vector<8x512xf32>
    tpu.vector_store %arg11[%c40_148, %c0_149], %138 {strides = array<i32>} : memref<72x512xf32, #tpu.memory_space<vmem>>, vector<8x512xf32>,
    %c0_150 = arith.constant 0 : index
    %c143_151 = arith.constant 143 : index
    %140 = vector.load %arg10[%c0_150, %c143_151] : memref<8x768xf32, #tpu.memory_space<vmem>>, vector<8x512xf32>
    %c6_152 = arith.constant 6 : index
    %c0_153 = arith.constant 0 : index
    %141 = vector.load %arg2[%c6_152, %c0_153] : memref<9x512xf32, #tpu.memory_space<vmem>>, vector<1x512xf32>
    %142 = vector.broadcast %141 : vector<1x512xf32> to vector<8x512xf32>
    %143 = arith.mulf %140, %142 : vector<8x512xf32>
    %c48_154 = arith.constant 48 : index
    %c0_155 = arith.constant 0 : index
    %144 = vector.load %arg11[%c48_154, %c0_155] : memref<72x512xf32, #tpu.memory_space<vmem>>, vector<8x512xf32>
    tpu.vector_store %arg11[%c48_154, %c0_155], %143 {strides = array<i32>} : memref<72x512xf32, #tpu.memory_space<vmem>>, vector<8x512xf32>,
    %c0_156 = arith.constant 0 : index
    %c144_157 = arith.constant 144 : index
    %145 = vector.load %arg10[%c0_156, %c144_157] : memref<8x768xf32, #tpu.memory_space<vmem>>, vector<8x512xf32>
    %c7_158 = arith.constant 7 : index
    %c0_159 = arith.constant 0 : index
    %146 = vector.load %arg2[%c7_158, %c0_159] : memref<9x512xf32, #tpu.memory_space<vmem>>, vector<1x512xf32>
    %147 = vector.broadcast %146 : vector<1x512xf32> to vector<8x512xf32>
    %148 = arith.mulf %145, %147 : vector<8x512xf32>
    %c56_160 = arith.constant 56 : index
    %c0_161 = arith.constant 0 : index
    %149 = vector.load %arg11[%c56_160, %c0_161] : memref<72x512xf32, #tpu.memory_space<vmem>>, vector<8x512xf32>
    tpu.vector_store %arg11[%c56_160, %c0_161], %148 {strides = array<i32>} : memref<72x512xf32, #tpu.memory_space<vmem>>, vector<8x512xf32>,
    %c0_162 = arith.constant 0 : index
    %c145_163 = arith.constant 145 : index
    %150 = vector.load %arg10[%c0_162, %c145_163] : memref<8x768xf32, #tpu.memory_space<vmem>>, vector<8x512xf32>
    %c8_164 = arith.constant 8 : index
    %c0_165 = arith.constant 0 : index
    %151 = vector.load %arg2[%c8_164, %c0_165] : memref<9x512xf32, #tpu.memory_space<vmem>>, vector<1x512xf32>
    %152 = vector.broadcast %151 : vector<1x512xf32> to vector<8x512xf32>
    %153 = arith.mulf %150, %152 : vector<8x512xf32>
    %c64_166 = arith.constant 64 : index
    %c0_167 = arith.constant 0 : index
    %154 = vector.load %arg11[%c64_166, %c0_167] : memref<72x512xf32, #tpu.memory_space<vmem>>, vector<8x512xf32>
    tpu.vector_store %arg11[%c64_166, %c0_167], %153 {strides = array<i32>} : memref<72x512xf32, #tpu.memory_space<vmem>>, vector<8x512xf32>,
    %c0_168 = arith.constant 0 : index
    %c0_169 = arith.constant 0 : index
    %155 = vector.load %arg11[%c0_168, %c0_169] : memref<72x512xf32, #tpu.memory_space<vmem>>, vector<72x512xf32>
    %cst_170 = arith.constant dense<0.000000e+00> : vector<8x512xf32>
    %156 = tpu.matmul %111, %155, %cst_170 {dimension_numbers = #tpu.dot_dimension_numbers<[1], [0], [0], [1], [0, 0, 1, 1], [], []>} : vector<8x72xf32>, vector<72x512xf32>, vector<8x512xf32> -> vector<8x512xf32>
    %157 = vector.broadcast %112 : vector<8x1xf32> to vector<8x512xf32>
    %158 = arith.addf %156, %157 : vector<8x512xf32>
    %159 = arith.addf %158, %58 : vector<8x512xf32>
    %160 = vector.extract_strided_slice %159 {offsets = [0, 0], sizes = [8, 256], strides = [1, 1]} : vector<8x512xf32> to vector<8x256xf32>
    %c0_171 = arith.constant 0 : index
    %c0_172 = arith.constant 0 : index
    %c0_173 = arith.constant 0 : index
    %161 = vector.load %arg9[%c0_171, %c0_172, %c0_173] : memref<2x8x256xf32, #tpu.memory_space<vmem>>, vector<1x8x256xf32>
    %162 = vector.shape_cast %161 : vector<1x8x256xf32> to vector<8x256xf32>
    %163 = vector.shape_cast %160 : vector<8x256xf32> to vector<1x8x256xf32>
    tpu.vector_store %arg9[%c0_171, %c0_172, %c0_173], %163 {strides = array<i32>} : memref<2x8x256xf32, #tpu.memory_space<vmem>>, vector<1x8x256xf32>,
    %164 = vector.extract_strided_slice %159 {offsets = [0, 256], sizes = [8, 256], strides = [1, 1]} : vector<8x512xf32> to vector<8x256xf32>
    %c1_174 = arith.constant 1 : index
    %c0_175 = arith.constant 0 : index
    %c0_176 = arith.constant 0 : index
    %165 = vector.load %arg9[%c1_174, %c0_175, %c0_176] : memref<2x8x256xf32, #tpu.memory_space<vmem>>, vector<1x8x256xf32>
    %166 = vector.shape_cast %165 : vector<1x8x256xf32> to vector<8x256xf32>
    %167 = vector.shape_cast %164 : vector<8x256xf32> to vector<1x8x256xf32>
    tpu.vector_store %arg9[%c1_174, %c0_175, %c0_176], %167 {strides = array<i32>} : memref<2x8x256xf32, #tpu.memory_space<vmem>>, vector<1x8x256xf32>,
    return
  }
  func.func @transform_0(%arg0: i32) -> (i32, i32, i32) {
    %c0_i32 = arith.constant 0 : i32
    %c0_i32_0 = arith.constant 0 : i32
    %c0_i32_1 = arith.constant 0 : i32
    return %arg0, %c0_i32, %c0_i32_0 : i32, i32, i32
  }
  func.func @transform_1(%arg0: i32) -> (i32, i32) {
    %c0_i32 = arith.constant 0 : i32
    %c0_i32_0 = arith.constant 0 : i32
    %c0_i32_1 = arith.constant 0 : i32
    return %c0_i32, %c0_i32_0 : i32, i32
  }
  func.func @transform_2(%arg0: i32) -> (i32, i32) {
    %c0_i32 = arith.constant 0 : i32
    %c0_i32_0 = arith.constant 0 : i32
    %c0_i32_1 = arith.constant 0 : i32
    return %c0_i32, %c0_i32_0 : i32, i32
  }
  func.func @transform_3(%arg0: i32) -> (i32, i32) {
    %c0_i32 = arith.constant 0 : i32
    %c0_i32_0 = arith.constant 0 : i32
    %c0_i32_1 = arith.constant 0 : i32
    return %c0_i32, %c0_i32_0 : i32, i32
  }
  func.func @transform_4(%arg0: i32) -> (i32, i32) {
    %c0_i32 = arith.constant 0 : i32
    %c0_i32_0 = arith.constant 0 : i32
    %c0_i32_1 = arith.constant 0 : i32
    return %c0_i32, %c0_i32_0 : i32, i32
  }
  func.func @transform_5(%arg0: i32) -> (i32, i32) {
    %c0_i32 = arith.constant 0 : i32
    %c0_i32_0 = arith.constant 0 : i32
    %c0_i32_1 = arith.constant 0 : i32
    return %c0_i32, %c0_i32_0 : i32, i32
  }
  func.func @transform_6(%arg0: i32) -> (i32, i32) {
    %c0_i32 = arith.constant 0 : i32
    %c0_i32_0 = arith.constant 0 : i32
    %c0_i32_1 = arith.constant 0 : i32
    return %c0_i32, %c0_i32_0 : i32, i32
  }
  func.func @transform_7(%arg0: i32) -> (i32, i32) {
    %c0_i32 = arith.constant 0 : i32
    %c0_i32_0 = arith.constant 0 : i32
    %c0_i32_1 = arith.constant 0 : i32
    return %c0_i32, %c0_i32_0 : i32, i32
  }
  func.func @transform_8(%arg0: i32) -> (i32, i32, i32) {
    %c0_i32 = arith.constant 0 : i32
    %c0_i32_0 = arith.constant 0 : i32
    %c0_i32_1 = arith.constant 0 : i32
    return %arg0, %c0_i32, %c0_i32_0 : i32, i32, i32
  }
}

</mosaic_0001>

<bundles_post_ra>
// kernel: resadd_forward.1
= control target key start
LH: loop header
LB: loop body
LE: loop exit
PB: predicated region body
PF: predicated region fallthrough
CT: control target
= control target key end

     0   :  { %v49_v0 = vlaneseq  ;;  %s2726_s29 = smov 111   ;;  %s2727_s10 = smov 112   ;;  %vm73_vm0 = vcmask 908288   ;;  %vm147_vm1 = vcmask 916480   ;;  %vm221_vm2 = vcmask 924672   ;;  %s3624_s1 = inlined_call_operand.vmem [shape: f32[9,512], index: 1, kind: input, shape index: {}]   ;;  %s3625_s0 = inlined_call_operand.vmem [shape: f32[2,8,256], index: 0, kind: input, shape index: {}]   ;;  %s3626_s5 = inlined_call_operand.vmem [shape: f32[8,1], index: 5, kind: input, shape index: {}]   ;;  %s3627_s2 = inlined_call_operand.vmem [shape: f32[8,72], index: 2, kind: input, shape index: {}]   ;;  %s3628_s6 = inlined_call_operand.vmem [shape: f32[8,1], index: 6, kind: input, shape index: {}]   ;;  %s3629_s3 = inlined_call_operand.vmem [shape: f32[8,72], index: 3, kind: input, shape index: {}]   ;;  %s3630_s7 = inlined_call_operand.vmem [shape: f32[8,1], index: 7, kind: input, shape index: {}]   ;;  %s3631_s4 = inlined_call_operand.vmem [shape: f32[8,72], index: 4, kind: input, shape index: {}]   ;;  %s3632_s8 = inlined_call_operand.vmem [shape: f32[2,8,256], index: 8, kind: output, shape index: {}]  }
   0x1   :  { %v47_v2 = vld [vmem:[%s3624_s1] ss:$8 sm:$0xf]  ;;  %v2379_v11 = vld [vmem:[%s3624_s1 + $0x1] ss:$8 sm:$0xf] }
   0x2   :  { %v50_v1 = vshrl.u32 %v49_v0, 7  ;;  %v2380_v16 = vld [vmem:[%s3624_s1 + $0x2] ss:$8 sm:$0xf]  ;;  %s2728_s13 = smov 113   ;;  %s2729_s16 = smov 127  }
   0x3   :  { %v2381_v21 = vld [vmem:[%s3624_s1 + $0x3] ss:$8 sm:$0xf]  ;;  %v2382_v26 = vld [vmem:[%s3624_s1 + $0x5] ss:$8 sm:$0xf] }
   0x4   :  { %v2784_v3 = vsub.s32 2, %v50_v1  ;;  %v2786_v4 = vsub.s32 0, %v50_v1  ;;  %v2788_v5 = vsub.s32 3, %v50_v1  ;;  %v2790_v6 = vsub.s32 1, %v50_v1  ;;  %s2730_s19 = smov 1   ;;  %s2731_s22 = smov 15  }
   0x5   :  { %v2383_v31 = vld [vmem:[%s3624_s1 + $0x6] ss:$8 sm:$0xf]  ;;  %v2384_v36 = vld [vmem:[%s3624_s1 + $0x7] ss:$8 sm:$0xf] }
   0x6   :  { %v60_v7 = vrot.slane %v47_v2, %v2784_v3  ;;  %v52_v8 = vrot.slane %v47_v2, %v2786_v4  ;;  %v64_v9 = vrot.slane %v47_v2, %v2788_v5  ;;  %v56_v10 = vrot.slane %v47_v2, %v2790_v6  ;;  %s2732_s25 = smov 16   ;;  %v2385_v41 = vld [vmem:[%s3624_s1 + $0x20] ss:$8 sm:$0xf]  ;;  %s2733_s28 = smov 17  }
   0x7   :  { %v130_v12 = vrot.slane %v2379_v11, %v2790_v6  ;;  %v126_v13 = vrot.slane %v2379_v11, %v2786_v4  ;;  %v138_v14 = vrot.slane %v2379_v11, %v2788_v5  ;;  %v134_v15 = vrot.slane %v2379_v11, %v2784_v3  ;;  %v2896_v2 = vld [vmem:[%s3625_s0] sm:$0xff] }
   0x8   :  { %69 = vrot.lane.b32.xlu1 %v60_v7, %s2726_s29  ;;  %65 = vrot.lane.b32.xlu0 %v52_v8, %s2726_s29  ;;  %v204_v17 = vrot.slane %v2380_v16, %v2790_v6  ;;  %v200_v18 = vrot.slane %v2380_v16, %v2786_v4  ;;  %v212_v19 = vrot.slane %v2380_v16, %v2788_v5  ;;  %vm295_vm3 = vcmask 1039360  }
   0x9   :  { %v208_v20 = vrot.slane %v2380_v16, %v2784_v3  ;;  %v278_v22 = vrot.slane %v2381_v21, %v2790_v6  ;;  %v274_v23 = vrot.slane %v2381_v21, %v2786_v4  ;;  %v286_v24 = vrot.slane %v2381_v21, %v2788_v5 }
   0xa   :  { %v282_v25 = vrot.slane %v2381_v21, %v2784_v3  ;;  %v360_v27 = vrot.slane %v2382_v26, %v2790_v6  ;;  %v356_v28 = vrot.slane %v2382_v26, %v2786_v4  ;;  %v368_v29 = vrot.slane %v2382_v26, %v2788_v5 }
   0xb   :  { %v364_v30 = vrot.slane %v2382_v26, %v2784_v3  ;;  %v432_v32 = vrot.slane %v2383_v31, %v2790_v6  ;;  %v428_v33 = vrot.slane %v2383_v31, %v2786_v4  ;;  %v440_v34 = vrot.slane %v2383_v31, %v2788_v5 }
   0xc   :  { %71 = vrot.lane.b32.xlu1 %v64_v9, %s2726_s29  ;;  %67 = vrot.lane.b32.xlu0 %v56_v10, %s2726_s29  ;;  %v436_v35 = vrot.slane %v2383_v31, %v2784_v3  ;;  %v504_v37 = vrot.slane %v2384_v36, %v2790_v6  ;;  %v500_v38 = vrot.slane %v2384_v36, %v2786_v4  ;;  %vm324_vm4 = vcmask 7168  }
   0xd   :  { %v508_v39 = vrot.slane %v2384_v36, %v2784_v3  ;;  %v512_v40 = vrot.slane %v2384_v36, %v2788_v5  ;;  %v576_v42 = vrot.slane %v2385_v41, %v2790_v6  ;;  %v572_v43 = vrot.slane %v2385_v41, %v2786_v4 }
   0xe   :  { %v584_v44 = vrot.slane %v2385_v41, %v2788_v5  ;;  %v580_v45 = vrot.slane %v2385_v41, %v2784_v3  ;;  %vm250_vm5 = vcmask 121856   ;;  %vm176_vm6 = vcmask 130048  }
   0xf   :  { %vm102_vm7 = vcmask 138240   ;;  %vm674_vm8 = vcmask 588800  }
  0x10   :  { %141 = vrot.lane.b32.xlu1 %v130_v12, %s2727_s10  ;;  %139 = vrot.lane.b32.xlu0 %v126_v13, %s2727_s10  ;;  %v2911_v13 = vld [vmem:[%s3625_s0 + $0x10] sm:$0xff] }
  0x14   :  { %145 = vrot.lane.b32.xlu1 %v138_v14, %s2727_s10  ;;  %143 = vrot.lane.b32.xlu0 %v134_v15, %s2727_s10  ;;  %v2916_v14 = vld [vmem:[%s3625_s0 + $0x18] sm:$0xff] }
  0x18   :  { %215 = vrot.lane.b32.xlu1 %v204_v17, %s2728_s13  ;;  %213 = vrot.lane.b32.xlu0 %v200_v18, %s2728_s13 }
  0x1c   :  { %219 = vrot.lane.b32.xlu1 %v212_v19, %s2728_s13  ;;  %217 = vrot.lane.b32.xlu0 %v208_v20, %s2728_s13 }
  0x20   :  { %289 = vrot.lane.b32.xlu1 %v278_v22, %s2729_s16  ;;  %287 = vrot.lane.b32.xlu0 %v274_v23, %s2729_s16  ;;  %v2929_v23 = vld [vmem:[%s3625_s0 + $0x8] sm:$0xff] }
  0x24   :  { %293 = vrot.lane.b32.xlu1 %v286_v24, %s2729_s16  ;;  %291 = vrot.lane.b32.xlu0 %v282_v25, %s2729_s16 }
  0x28   :  { %371 = vrot.lane.b32.xlu1 %v360_v27, %s2730_s19  ;;  %369 = vrot.lane.b32.xlu0 %v356_v28, %s2730_s19 }
  0x2c   :  { %375 = vrot.lane.b32.xlu1 %v368_v29, %s2730_s19  ;;  %373 = vrot.lane.b32.xlu0 %v364_v30, %s2730_s19 }
  0x30   :  { %443 = vrot.lane.b32.xlu1 %v432_v32, %s2731_s22  ;;  %441 = vrot.lane.b32.xlu0 %v428_v33, %s2731_s22 }
  0x34   :  { %447 = vrot.lane.b32.xlu1 %v440_v34, %s2731_s22  ;;  %445 = vrot.lane.b32.xlu0 %v436_v35, %s2731_s22 }
  0x38   :  { %515 = vrot.lane.b32.xlu1 %v504_v37, %s2732_s25  ;;  %513 = vrot.lane.b32.xlu0 %v500_v38, %s2732_s25 }
  0x3c   :  { %517 = vrot.lane.b32.xlu0 %v508_v39, %s2732_s25  ;;  %519 = vrot.lane.b32.xlu1 %v512_v40, %s2732_s25 }
  0x40   :  { %587 = vrot.lane.b32.xlu1 %v576_v42, %s2733_s28  ;;  %585 = vrot.lane.b32.xlu0 %v572_v43, %s2733_s28 }
  0x44   :  { %591 = vrot.lane.b32.xlu1 %v584_v44, %s2733_s28  ;;  %589 = vrot.lane.b32.xlu0 %v580_v45, %s2733_s28 }
  0x7a   :  { %v70_v46 = vpop.permute.xlu1 %69  ;;  %v66_v47 = vpop.permute.xlu0 %65 }
  0x7b   :  { %v82_v48 = vmul.f32 0.0, %v66_v47 }
  0x7d   :  { %92 = vrot.lane.b32.xlu0 %v82_v48, %s2733_s28 }
  0x7e   :  { %v72_v49 = vpop.permute.xlu1 %71  ;;  %v68_v50 = vpop.permute.xlu0 %67 }
  0x7f   :  { %v76_v12 = vsel %vm73_vm0, %v70_v46, %v72_v49  ;;  %v86_v17 = vmul.f32 %v2916_v14, %v72_v49  ;;  %v74_v21 = vsel %vm73_vm0, %v66_v47, %v68_v50  ;;  %v75_v24 = vsel %vm73_vm0, %v68_v50, %v70_v46 }
  0x80   :  { %v85_v16 = vmul.f32 %v2911_v13, %v76_v12  ;;  %v83_v30 = vmul.f32 %v74_v21, %v2896_v2  ;;  %v84_v31 = vmul.f32 %v75_v24, %v2929_v23 }
  0x82   :  { %v142_v51 = vpop.permute.xlu1 %141  ;;  %v140_v52 = vpop.permute.xlu0 %139  ;;  %v2519_v27 = vpack.i.bf16 %v86_v17, %v85_v16  ;;  %v2514_v45 = vpack.i.bf16 %v84_v31, %v83_v30 }
  0x83   :  { %v156_v53 = vmul.f32 0.0, %v140_v52  ;;  %v148_v39 = vsel %vm147_vm1, %v140_v52, %v142_v51 }
  0x84   :  { %v157_v46 = vmul.f32 %v148_v39, %v2896_v2 }
  0x85   :  { %166 = vrot.lane.b32.xlu1 %v156_v53, %s2732_s25 }
  0x86   :  { %v146_v54 = vpop.permute.xlu1 %145  ;;  %v144_v55 = vpop.permute.xlu0 %143 }
  0x87   :  { %v150_v20 = vsel %vm147_vm1, %v144_v55, %v146_v54  ;;  %v160_v25 = vmul.f32 %v2916_v14, %v146_v54  ;;  %v149_v32 = vsel %vm147_vm1, %v142_v51, %v144_v55 }
  0x88   :  { %v159_v26 = vmul.f32 %v2911_v13, %v150_v20  ;;  %v158_v40 = vmul.f32 %v149_v32, %v2929_v23 }
  0x8a   :  { %v2879_v56 = vpop.permute.xlu1 %215  ;;  %v2881_v57 = vpop.permute.xlu0 %213  ;;  %v2529_v37 = vpack.i.bf16 %v160_v25, %v159_v26  ;;  %v2524_v50 = vpack.i.bf16 %v158_v40, %v157_v46 }
  0x8b   :  { %v230_v58 = vmul.f32 0.0, %v2881_v57  ;;  %v222_v49 = vsel %vm221_vm2, %v2881_v57, %v2879_v56 }
  0x8d   :  { %240 = vrot.lane.b32.xlu0 %v230_v58, %s2731_s22 }
  0x8e   :  { %v220_v59 = vpop.permute.xlu1 %219  ;;  %v218_v60 = vpop.permute.xlu0 %217 }
  0x8f   :  { %v224_v28 = vsel %vm221_vm2, %v218_v60, %v220_v59  ;;  %v234_v34 = vmul.f32 %v2916_v14, %v220_v59  ;;  %v223_v47 = vsel %vm221_vm2, %v2879_v56, %v218_v60  ;;  %v231_v60 = vmul.f32 %v222_v49, %v2896_v2  ;;  %v41_v49 = vld [vmem:[%s3626_s5] sm:$0xff] }
  0x90   :  { %v233_v35 = vmul.f32 %v2911_v13, %v224_v28  ;;  %v232_v51 = vmul.f32 %v223_v47, %v2929_v23 }
  0x92   :  { %v2885_v61 = vpop.permute.xlu1 %289  ;;  %v2887_v62 = vpop.permute.xlu0 %287  ;;  %v2539_v44 = vpack.i.bf16 %v234_v34, %v233_v35 }
  0x93   :  { %v304_v63 = vmul.f32 0.0, %v2887_v62  ;;  %v296_v56 = vsel %vm295_vm3, %v2887_v62, %v2885_v61 }
  0x94   :  { %v305_v17 = vmul.f32 %v296_v56, %v2896_v2 }
  0x95   :  { %314 = vrot.lane.b32.xlu1 %v304_v63, %s2730_s19 }
  0x96   :  { %v294_v0 = vpop.permute.xlu1 %293  ;;  %v2891_v1 = vpop.permute.xlu0 %291 }
  0x97   :  { %v298_v38 = vsel %vm295_vm3, %v2891_v1, %v294_v0  ;;  %v308_v41 = vmul.f32 %v2916_v14, %v294_v0  ;;  %v297_v58 = vsel %vm295_vm3, %v2885_v61, %v2891_v1 }
  0x98   :  { %v307_v42 = vmul.f32 %v2911_v13, %v298_v38  ;;  %v306_v0 = vmul.f32 %v297_v58, %v2929_v23  ;;  %v2734_v38 = vmov 0.0  }
  0x99   :  { %742 = vmatprep.mubr.f32.mxu0 %v2734_v38  ;;  %813 = vmatprep.mubr.f32.mxu1 %v2734_v38 }
  0x9a   :  { %v2898_v7 = vpop.permute.xlu1 %371  ;;  %v2900_v8 = vpop.permute.xlu0 %369  ;;  %v2549_v54 = vpack.i.bf16 %v308_v41, %v307_v42  ;;  %v2544_v24 = vpack.i.bf16 %v306_v0, %v305_v17  ;;  %v2735_v42 = vmov 0   ;;  %v2390_v0 = vld [vmem:[%s3624_s1 + $0x3] ss:$8 sm:$0xf] }
  0x9b   :  { %v385_v9 = vmul.f32 %v2900_v8, %v2896_v2  ;;  %2584 = vset.pattern.permute.xlu0 %v2735_v42  ;;  %2725 = vset.pattern.permute.xlu1 %v2735_v42 }
  0x9d   :  { %395 = vrot.lane.b32.xlu0 %v385_v9, %s2729_s16 }
  0x9e   :  { %v376_v10 = vpop.permute.xlu1 %375  ;;  %v2905_v11 = vpop.permute.xlu0 %373 }
  0x9f   :  { %v379_v48 = vsel %vm324_vm4, %v2905_v11, %v376_v10  ;;  %v389_v52 = vmul.f32 0.0, %v376_v10  ;;  %v2534_v10 = vpack.i.bf16 %v232_v51, %v231_v60  ;;  %v378_v12 = vsel %vm324_vm4, %v2898_v7, %v2905_v11 }
  0xa0   :  { %v388_v53 = vmul.f32 %v2916_v14, %v379_v48  ;;  %v387_v11 = vmul.f32 %v2911_v13, %v378_v12  ;;  %v1065_v12 = vrot.slane %v2390_v0, %v2788_v5 }
  0xa2   :  { %v442_v15 = vpop.permute.xlu0 %441  ;;  %v444_v18 = vpop.permute.xlu1 %443  ;;  %v2559_v9 = vpack.i.bf16 %v389_v52, %v388_v53  ;;  %v2388_v52 = vld [vmem:[%s3624_s1 + $0x1] ss:$8 sm:$0xf] }
  0xa3   :  { %v457_v19 = vmul.f32 %v442_v15, %v2896_v2  ;;  %v449_v57 = vsel %vm250_vm5, %v442_v15, %v444_v18  ;;  %v377_v15 = vsel %vm324_vm4, %v2900_v8, %v2898_v7  ;;  %v911_v53 = vrot.slane %v2388_v52, %v2786_v4 }
  0xa4   :  { %v386_v26 = vmul.f32 %v377_v15, %v2929_v23  ;;  %v923_v58 = vrot.slane %v2388_v52, %v2788_v5  ;;  %v2392_v15 = vld [vmem:[%s3624_s1 + $0x6] ss:$8 sm:$0xf] }
  0xa5   :  { %467 = vrot.lane.b32.xlu1 %v457_v19, %s2728_s13  ;;  %v458_v19 = vmul.f32 %v449_v57, %v2929_v23 }
  0xa6   :  { %v2924_v22 = vpop.permute.xlu0 %445  ;;  %v2935_v29 = vpop.permute.xlu1 %447  ;;  %v2554_v31 = vpack.i.bf16 %v387_v11, %v386_v26  ;;  %v1207_v11 = vrot.slane %v2392_v15, %v2790_v6 }
  0xa7   :  { %v450_v59 = vsel %vm250_vm5, %v444_v18, %v2924_v22  ;;  %v451_v25 = vsel %vm250_vm5, %v2924_v22, %v2935_v29  ;;  %v461_v8 = vmul.f32 0.0, %v2935_v29 }
  0xa8   :  { %v459_v1 = vmul.f32 %v2911_v13, %v450_v59  ;;  %v460_v28 = vmul.f32 %v2916_v14, %v451_v25  ;;  %v2389_v59 = vld [vmem:[%s3624_s1 + $0x2] ss:$8 sm:$0xf] }
  0xa9   :  { %2520 = vrot.lane.b32.xlu1 %v2519_v27, %s2733_s28  ;;  %v982_v60 = vrot.slane %v2389_v59, %v2786_v4  ;;  %v990_v56 = vrot.slane %v2389_v59, %v2784_v3  ;;  %v994_v57 = vrot.slane %v2389_v59, %v2788_v5 }
  0xaa   :  { %v514_v33 = vpop.permute.xlu0 %513  ;;  %v516_v43 = vpop.permute.xlu1 %515  ;;  %v2564_v21 = vpack.i.bf16 %v459_v1, %v458_v19  ;;  %v2569_v29 = vpack.i.bf16 %v461_v8, %v460_v28  ;;  %v1053_v1 = vrot.slane %v2390_v0, %v2786_v4  ;;  %v2394_v8 = vld [vmem:[%s3624_s1 + $0x20] ss:$8 sm:$0xf] }
  0xab   :  { %v529_v36 = vmul.f32 %v514_v33, %v2896_v2  ;;  %v521_v18 = vsel %vm176_vm6, %v514_v33, %v516_v43  ;;  %v1345_v28 = vrot.slane %v2394_v8, %v2786_v4 }
  0xac   :  { %v530_v27 = vmul.f32 %v521_v18, %v2929_v23  ;;  %v1203_v18 = vrot.slane %v2392_v15, %v2786_v4 }
  0xad   :  { %2530 = vrot.lane.b32.xlu1 %v2529_v37, %s2732_s25  ;;  %539 = vrot.lane.b32.xlu0 %v529_v36, %s2727_s10 }
  0xae   :  { %v520_v55 = vpop.permute.xlu1 %519  ;;  %v518_v63 = vpop.permute.xlu0 %517 }
  0xaf   :  { %v522_v16 = vsel %vm176_vm6, %v516_v43, %v518_v63  ;;  %v523_v22 = vsel %vm176_vm6, %v518_v63, %v520_v55  ;;  %v533_v37 = vmul.f32 0.0, %v520_v55  ;;  %v835_v43 = vld [vmem:[%s3624_s1] ss:$8 sm:$0xf]  ;;  %v919_v55 = vrot.slane %v2388_v52, %v2784_v3 }
  0xb0   :  { %v531_v20 = vmul.f32 %v2911_v13, %v522_v16  ;;  %v532_v36 = vmul.f32 %v2916_v14, %v523_v22  ;;  %v840_v46 = vrot.slane %v835_v43, %v2786_v4  ;;  %v844_v48 = vrot.slane %v835_v43, %v2790_v6  ;;  %v2391_v16 = vld [vmem:[%s3624_s1 + $0x5] ss:$8 sm:$0xf] }
  0xb1   :  { %2540 = vrot.lane.b32.xlu1 %v2539_v44, %s2731_s22  ;;  %2515 = vrot.lane.b32.xlu0 %v2514_v45, %s2733_s28  ;;  %v852_v51 = vrot.slane %v835_v43, %v2788_v5  ;;  %v986_v63 = vrot.slane %v2389_v59, %v2790_v6  ;;  %v1132_v17 = vrot.slane %v2391_v16, %v2786_v4 }
  0xb2   :  { %v588_v61 = vpop.permute.xlu1 %587  ;;  %v586_v62 = vpop.permute.xlu0 %585  ;;  %v2574_v30 = vpack.i.bf16 %v531_v20, %v530_v27  ;;  %v2579_v40 = vpack.i.bf16 %v533_v37, %v532_v36  ;;  %v1136_v19 = vrot.slane %v2391_v16, %v2790_v6  ;;  %v1211_v20 = vrot.slane %v2392_v15, %v2784_v3 }
  0xb3   :  { %v593_v7 = vsel %vm102_vm7, %v586_v62, %v588_v61  ;;  %v601_v44 = vmul.f32 %v586_v62, %v2896_v2  ;;  %v1144_v62 = vrot.slane %v2391_v16, %v2788_v5 }
  0xb4   :  { %v602_v34 = vmul.f32 %v593_v7, %v2929_v23 }
  0xb5   :  { %2550 = vrot.lane.b32.xlu1 %v2549_v54, %s2730_s19  ;;  %2525 = vrot.lane.b32.xlu0 %v2524_v50, %s2732_s25  ;;  %v848_v50 = vrot.slane %v835_v43, %v2784_v3  ;;  %v915_v54 = vrot.slane %v2388_v52, %v2790_v6 }
  0xb6   :  { %v592_v32 = vpop.permute.xlu1 %591  ;;  %v590_v33 = vpop.permute.xlu0 %589 }
  0xb7   :  { %v595_v35 = vsel %vm102_vm7, %v590_v33, %v592_v32  ;;  %v594_v41 = vsel %vm102_vm7, %v588_v61, %v590_v33  ;;  %v605_v47 = vmul.f32 0.0, %v592_v32  ;;  %v1140_v61 = vrot.slane %v2391_v16, %v2784_v3 }
  0xb8   :  { %v604_v39 = vmul.f32 %v2916_v14, %v595_v35  ;;  %v603_v45 = vmul.f32 %v2911_v13, %v594_v41  ;;  %v1357_v32 = vrot.slane %v2394_v8, %v2788_v5 }
  0xb9   :  { %2560 = vrot.lane.b32.xlu1 %v2559_v9, %s2729_s16  ;;  %2535 = vrot.lane.b32.xlu0 %v2534_v10, %s2731_s22  ;;  %v1057_v9 = vrot.slane %v2390_v0, %v2790_v6  ;;  %v1061_v10 = vrot.slane %v2390_v0, %v2784_v3 }
  0xbd   :  { %2565 = vrot.lane.b32.xlu1 %v2564_v21, %s2728_s13  ;;  %2545 = vrot.lane.b32.xlu0 %v2544_v24, %s2730_s19  ;;  %v1215_v21 = vrot.slane %v2392_v15, %v2788_v5  ;;  %v2393_v24 = vld [vmem:[%s3624_s1 + $0x7] ss:$8 sm:$0xf] }
  0xbe   :  { %v1274_v25 = vrot.slane %v2393_v24, %v2786_v4  ;;  %v1278_v26 = vrot.slane %v2393_v24, %v2790_v6  ;;  %v1282_v27 = vrot.slane %v2393_v24, %v2784_v3  ;;  %v1286_v7 = vrot.slane %v2393_v24, %v2788_v5 }
  0xc1   :  { %2575 = vrot.lane.b32.xlu1 %v2574_v30, %s2727_s10  ;;  %2555 = vrot.lane.b32.xlu0 %v2554_v31, %s2729_s16  ;;  %v1349_v30 = vrot.slane %v2394_v8, %v2790_v6  ;;  %v1353_v31 = vrot.slane %v2394_v8, %v2784_v3 }
  0xc5   :  { %613 = vrot.lane.b32.xlu1 %v602_v34, %s2726_s29  ;;  %2570 = vrot.lane.b32.xlu0 %v2569_v29, %s2728_s13 }
  0xc9   :  { %617 = vrot.lane.b32.xlu1 %v604_v39, %s2726_s29  ;;  %2580 = vrot.lane.b32.xlu0 %v2579_v40, %s2727_s10 }
  0xcd   :  { %611 = vrot.lane.b32.xlu1 %v601_v44, %s2726_s29  ;;  %615 = vrot.lane.b32.xlu0 %v603_v45, %s2726_s29 }
  0xd1   :  { %619 = vrot.lane.b32.xlu0 %v605_v47, %s2726_s29  ;;  %853 = vrot.lane.b32.xlu1 %v840_v46, %s2726_s29 }
  0xd5   :  { %671 = vperm.xlu0 %2584, %v41_v49   ;;  %855 = vrot.lane.b32.xlu1 %v844_v48, %s2726_s29 }
  0xd9   :  { %857 = vrot.lane.b32.xlu0 %v848_v50, %s2726_s29  ;;  %859 = vrot.lane.b32.xlu1 %v852_v51, %s2726_s29 }
  0xdd   :  { %924 = vrot.lane.b32.xlu0 %v911_v53, %s2727_s10  ;;  %926 = vrot.lane.b32.xlu1 %v915_v54, %s2727_s10 }
  0xe1   :  { %928 = vrot.lane.b32.xlu0 %v919_v55, %s2727_s10  ;;  %930 = vrot.lane.b32.xlu1 %v923_v58, %s2727_s10 }
  0xe5   :  { %995 = vrot.lane.b32.xlu0 %v982_v60, %s2728_s13  ;;  %997 = vrot.lane.b32.xlu1 %v986_v63, %s2728_s13 }
  0xe9   :  { %999 = vrot.lane.b32.xlu0 %v990_v56, %s2728_s13  ;;  %1001 = vrot.lane.b32.xlu1 %v994_v57, %s2728_s13 }
  0xed   :  { %1066 = vrot.lane.b32.xlu0 %v1053_v1, %s2729_s16  ;;  %1068 = vrot.lane.b32.xlu1 %v1057_v9, %s2729_s16 }
  0xef   :  { %v93_v22 = vpop.permute.xlu0 %92 }
  0xf1   :  { %1070 = vrot.lane.b32.xlu0 %v1061_v10, %s2729_s16  ;;  %1072 = vrot.lane.b32.xlu1 %v1065_v12, %s2729_s16 }
  0xf5   :  { %1145 = vrot.lane.b32.xlu0 %v1132_v17, %s2730_s19  ;;  %1147 = vrot.lane.b32.xlu1 %v1136_v19, %s2730_s19 }
  0xf7   :  { %v167_v33 = vpop.permute.xlu1 %166 }
  0xf9   :  { %1149 = vrot.lane.b32.xlu0 %v1140_v61, %s2730_s19  ;;  %1151 = vrot.lane.b32.xlu1 %v1144_v62, %s2730_s19 }
  0xfd   :  { %1216 = vrot.lane.b32.xlu0 %v1203_v18, %s2731_s22  ;;  %1218 = vrot.lane.b32.xlu1 %v1207_v11, %s2731_s22 }
  0xff   :  { %v241_v35 = vpop.permute.xlu0 %240 }
 0x101   :  { %1220 = vrot.lane.b32.xlu0 %v1211_v20, %s2731_s22  ;;  %1222 = vrot.lane.b32.xlu1 %v1215_v21, %s2731_s22 }
 0x105   :  { %1287 = vrot.lane.b32.xlu0 %v1274_v25, %s2732_s25  ;;  %1289 = vrot.lane.b32.xlu1 %v1278_v26, %s2732_s25 }
 0x107   :  { %v315_v34 = vpop.permute.xlu1 %314 }
 0x109   :  { %1291 = vrot.lane.b32.xlu0 %v1282_v27, %s2732_s25  ;;  %1293 = vrot.lane.b32.xlu1 %v1286_v7, %s2732_s25 }
 0x10d   :  { %1358 = vrot.lane.b32.xlu0 %v1345_v28, %s2733_s28  ;;  %1360 = vrot.lane.b32.xlu1 %v1349_v30, %s2733_s28 }
 0x10f   :  { %v3114_v37 = vpop.permute.xlu0 %395 }
 0x111   :  { %1362 = vrot.lane.b32.xlu0 %v1353_v31, %s2733_s28  ;;  %1364 = vrot.lane.b32.xlu1 %v1357_v32, %s2733_s28 }
 0x117   :  { %v3112_v36 = vpop.permute.xlu1 %467 }
 0x11b   :  { %v2521_v29 = vpop.permute.xlu1 %2520 }
 0x11c   :  { %v2523_v39 = vunpack.i.h.bf16 %v2521_v29  ;;  %v2522_v40 = vunpack.i.l.bf16 %v2521_v29 }
 0x11e   :  { %v106_v45 = vsel %vm102_vm7, %v2522_v40, %v2523_v39 }
 0x11f   :  { %v2531_v41 = vpop.permute.xlu1 %2530  ;;  %v3116_v42 = vpop.permute.xlu0 %539 }
 0x120   :  { %v2533_v43 = vunpack.i.h.bf16 %v2531_v41  ;;  %v2532_v44 = vunpack.i.l.bf16 %v2531_v41 }
 0x122   :  { %v180_v46 = vsel %vm176_vm6, %v2532_v44, %v2533_v43 }
 0x123   :  { %v2541_v47 = vpop.permute.xlu1 %2540  ;;  %v2516_v48 = vpop.permute.xlu0 %2515  ;;  %v2424_v49 = vpack.c.bf16 %v180_v46, %v106_v45 }
 0x124   :  { %v2543_v50 = vunpack.i.h.bf16 %v2541_v47  ;;  %v2542_v51 = vunpack.i.l.bf16 %v2541_v47  ;;  %v2518_v52 = vunpack.i.h.bf16 %v2516_v48  ;;  %v2517_v53 = vunpack.i.l.bf16 %v2516_v48 }
 0x125   :  { %2425 = vmatprep.subr.bf16.mxu1 %v2424_v49 }
 0x126   :  { %v104_v56 = vsel %vm102_vm7, %v2517_v53, %v2518_v52  ;;  %v105_v57 = vsel %vm102_vm7, %v2518_v52, %v2522_v40  ;;  %v103_v0 = vsel %vm102_vm7, %v93_v22, %v2517_v53  ;;  %v254_v1 = vsel %vm250_vm5, %v2542_v51, %v2543_v50 }
 0x127   :  { %v2551_v54 = vpop.permute.xlu1 %2550  ;;  %v2526_v55 = vpop.permute.xlu0 %2525 }
 0x128   :  { %v2553_v58 = vunpack.i.h.bf16 %v2551_v54  ;;  %v2552_v59 = vunpack.i.l.bf16 %v2551_v54  ;;  %v2528_v60 = vunpack.i.h.bf16 %v2526_v55  ;;  %v2527_v63 = vunpack.i.l.bf16 %v2526_v55 }
 0x12a   :  { %v178_v9 = vsel %vm176_vm6, %v2527_v63, %v2528_v60  ;;  %v179_v10 = vsel %vm176_vm6, %v2528_v60, %v2532_v44  ;;  %v177_v12 = vsel %vm176_vm6, %v167_v33, %v2527_v63  ;;  %v328_v16 = vsel %vm324_vm4, %v2552_v59, %v2553_v58 }
 0x12b   :  { %v2561_v17 = vpop.permute.xlu1 %2560  ;;  %v2536_v19 = vpop.permute.xlu0 %2535  ;;  %v2408_v61 = vpack.c.bf16 %v178_v9, %v104_v56  ;;  %v2426_v62 = vpack.c.bf16 %v179_v10, %v105_v57  ;;  %v2410_v15 = vpack.c.bf16 %v177_v12, %v103_v0  ;;  %v2428_v18 = vpack.c.bf16 %v328_v16, %v254_v1 }
 0x12c   :  { %v2563_v11 = vunpack.i.h.bf16 %v2561_v17  ;;  %v2562_v20 = vunpack.i.l.bf16 %v2561_v17  ;;  %v2538_v21 = vunpack.i.h.bf16 %v2536_v19  ;;  %v2537_v24 = vunpack.i.l.bf16 %v2536_v19 }
 0x12d   :  { %2409 = vmatprep.subr.bf16.mxu0 %v2408_v61  ;;  %2427 = vmatpush1.bf16.msra.mxu1 %v2426_v62 }
 0x12e   :  { %2411 = vmatpush1.bf16.msra.mxu0 %v2410_v15  ;;  %2429 = vmatprep.subr.bf16.mxu1 %v2428_v18  ;;  %v408_v8 = vsel %vm295_vm3, %v2562_v20, %v2563_v11  ;;  %v252_v30 = vsel %vm250_vm5, %v2537_v24, %v2538_v21  ;;  %v253_v31 = vsel %vm250_vm5, %v2538_v21, %v2542_v51  ;;  %v40_v15 = vld [vmem:[%s3627_s2] sm:$0xff] }
 0x12f   :  { %v2566_v25 = vpop.permute.xlu1 %2565  ;;  %v2546_v26 = vpop.permute.xlu0 %2545  ;;  %v251_v32 = vsel %vm250_vm5, %v241_v35, %v2537_v24  ;;  %v2432_v46 = vpack.c.bf16 %v408_v8, %v2916_v14 }
 0x130   :  { %v2548_v27 = vunpack.i.h.bf16 %v2546_v26  ;;  %v2547_v7 = vunpack.i.l.bf16 %v2546_v26  ;;  %v2568_v28 = vunpack.i.h.bf16 %v2566_v25  ;;  %v2567_v33 = vunpack.i.l.bf16 %v2566_v25 }
 0x132   :  { %v326_v22 = vsel %vm324_vm4, %v2547_v7, %v2548_v27  ;;  %v327_v29 = vsel %vm324_vm4, %v2548_v27, %v2552_v59  ;;  %v325_v39 = vsel %vm324_vm4, %v315_v34, %v2547_v7  ;;  %v478_v59 = vsel %vm221_vm2, %v2567_v33, %v2568_v28 }
 0x133   :  { %v2576_v40 = vpop.permute.xlu1 %2575  ;;  %v2556_v41 = vpop.permute.xlu0 %2555  ;;  %v2412_v43 = vpack.c.bf16 %v326_v22, %v252_v30  ;;  %v2430_v44 = vpack.c.bf16 %v327_v29, %v253_v31  ;;  %v2414_v45 = vpack.c.bf16 %v325_v39, %v251_v32 }
 0x134   :  { %v2578_v47 = vunpack.i.h.bf16 %v2576_v40  ;;  %v2577_v48 = vunpack.i.l.bf16 %v2576_v40  ;;  %v2558_v49 = vunpack.i.h.bf16 %v2556_v41  ;;  %v2557_v50 = vunpack.i.l.bf16 %v2556_v41 }
 0x135   :  { %2413 = vmatprep.subr.bf16.mxu0 %v2412_v43  ;;  %2431 = vmatpush1.bf16.msra.mxu1 %v2430_v44 }
 0x136   :  { %2415 = vmatpush1.bf16.msra.mxu0 %v2414_v45  ;;  %2433 = vmatprep.subr.bf16.mxu1 %v2432_v46  ;;  %v406_v35 = vsel %vm295_vm3, %v2557_v50, %v2558_v49  ;;  %v407_v51 = vsel %vm295_vm3, %v2558_v49, %v2562_v20  ;;  %v405_v34 = vsel %vm295_vm3, %v3114_v37, %v2557_v50 }
 0x137   :  { %v614_v52 = vpop.permute.xlu1 %613  ;;  %v2571_v53 = vpop.permute.xlu0 %2570  ;;  %v2416_v54 = vpack.c.bf16 %v406_v35, %v2929_v23  ;;  %v2434_v14 = vpack.c.bf16 %v407_v51, %v2911_v13  ;;  %v2418_v55 = vpack.c.bf16 %v405_v34, %v2896_v2  ;;  %v550_v58 = vsel %vm147_vm1, %v2577_v48, %v2578_v47 }
 0x138   :  { %v2420_v60 = vpack.c.bf16 %v550_v58, %v478_v59  ;;  %v549_v63 = vsel %vm147_vm1, %v3116_v42, %v2577_v48  ;;  %v2573_v56 = vunpack.i.h.bf16 %v2571_v53  ;;  %v2572_v37 = vunpack.i.l.bf16 %v2571_v53 }
 0x139   :  { %2417 = vmatprep.subr.bf16.mxu0 %v2416_v54  ;;  %2435 = vmatpush1.bf16.msra.mxu1 %v2434_v14  ;;  %v477_v13 = vsel %vm221_vm2, %v3112_v36, %v2567_v33 }
 0x13a   :  { %2419 = vmatpush1.bf16.msra.mxu0 %v2418_v55  ;;  %v2422_v1 = vpack.c.bf16 %v549_v63, %v477_v13  ;;  %v480_v9 = vsel %vm221_vm2, %v2572_v37, %v2573_v56  ;;  %v479_v12 = vsel %vm221_vm2, %v2568_v28, %v2572_v37 }
 0x13b   :  { %v618_v57 = vpop.permute.xlu1 %617  ;;  %v2581_v0 = vpop.permute.xlu0 %2580  ;;  %2421 = vmatprep.subr.bf16.mxu0 %v2420_v60 }
 0x13c   :  { %v2583_v2 = vunpack.i.h.bf16 %v2581_v0  ;;  %v2582_v23 = vunpack.i.l.bf16 %v2581_v0 }
 0x13e   :  { %2423 = vmatpush1.bf16.msra.mxu0 %v2422_v1  ;;  %v552_v10 = vsel %vm147_vm1, %v2582_v23, %v2583_v2  ;;  %v551_v42 = vsel %vm147_vm1, %v2578_v47, %v2582_v23 }
 0x13f   :  { %v612_v16 = vpop.permute.xlu1 %611  ;;  %v616_v17 = vpop.permute.xlu0 %615  ;;  %v2436_v19 = vpack.c.bf16 %v552_v10, %v480_v9  ;;  %v2438_v61 = vpack.c.bf16 %v551_v42, %v479_v12 }
 0x140   :  { %v622_v62 = vsel %vm73_vm0, %v614_v52, %v616_v17  ;;  %v621_v36 = vsel %vm73_vm0, %v612_v16, %v614_v52  ;;  %v623_v24 = vsel %vm73_vm0, %v616_v17, %v618_v57 }
 0x141   :  { %694 = vmatprep.subr.mxu0 %v622_v62  ;;  %2437 = vmatprep.subr.bf16.mxu1 %v2436_v19 }
 0x142   :  { %695 = vmatpush1.msra.mxu0 %v621_v36  ;;  %2439 = vmatpush1.bf16.msra.mxu1 %v2438_v61 }
 0x143   :  { %v620_v18 = vpop.permute.xlu0 %619  ;;  %2386 = vmatmul.mubr.msk.f32.vlgmr.msra.gmra.mrb[0].mxu0 %vm674_vm8, %v40_v15  ;;  %v854_v11 = vpop.permute.xlu1 %853 }
 0x144   :  { %v624_v20 = vsel %vm73_vm0, %v618_v57, %v620_v18  ;;  %v869_v21 = vmul.f32 0.0, %v854_v11  ;;  %1514 = vmatprep.mubr.f32.mxu0 %v2734_v38 }
 0x145   :  { %765 = vmatprep.subr.mxu1 %v624_v20 }
 0x146   :  { %766 = vmatpush1.msra.mxu1 %v623_v24  ;;  %879 = vrot.lane.b32.xlu0 %v869_v21, %s2733_s28 }
 0x147   :  { %2387 = vmatmul.mubr.msk.f32.vlgmr.msra.gmra.mrb[0].mxu1 %vm674_vm8, %v40_v15  ;;  %v856_v22 = vpop.permute.xlu1 %855 }
 0x148   :  { %1585 = vmatprep.mubr.f32.mxu1 %v2734_v38  ;;  %v861_v0 = vsel %vm73_vm0, %v854_v11, %v856_v22 }
 0x14b   :  { %v860_v29 = vpop.permute.xlu1 %859 }
 0x14f   :  { %v927_v39 = vpop.permute.xlu1 %926 }
 0x153   :  { %v931_v40 = vpop.permute.xlu1 %930 }
 0x154   :  { %v672_v25 = vpop.permute.xlu0 %671 }
 0x157   :  { %v998_v41 = vpop.permute.xlu1 %997 }
 0x158   :  { %v858_v26 = vpop.permute.xlu0 %857 }
 0x159   :  { %v862_v13 = vsel %vm73_vm0, %v856_v22, %v858_v26  ;;  %v863_v2 = vsel %vm73_vm0, %v858_v26, %v860_v29 }
 0x15b   :  { %v1002_v43 = vpop.permute.xlu1 %1001 }
 0x15c   :  { %v925_v27 = vpop.permute.xlu0 %924 }
 0x15d   :  { %v940_v7 = vmul.f32 0.0, %v925_v27  ;;  %v932_v19 = vsel %vm147_vm1, %v925_v27, %v927_v39 }
 0x15f   :  { %950 = vrot.lane.b32.xlu1 %v940_v7, %s2732_s25  ;;  %v1069_v45 = vpop.permute.xlu1 %1068 }
 0x160   :  { %v929_v8 = vpop.permute.xlu0 %928 }
 0x161   :  { %v934_v61 = vsel %vm147_vm1, %v929_v8, %v931_v40  ;;  %v933_v62 = vsel %vm147_vm1, %v927_v39, %v929_v8 }
 0x163   :  { %v1073_v47 = vpop.permute.xlu1 %1072 }
 0x164   :  { %v996_v28 = vpop.permute.xlu0 %995 }
 0x165   :  { %v1011_v30 = vmul.f32 0.0, %v996_v28 }
 0x167   :  { %1021 = vrot.lane.b32.xlu0 %v1011_v30, %s2731_s22  ;;  %v3175_v49 = vpop.permute.xlu1 %1147 }
 0x168   :  { %v1000_v31 = vpop.permute.xlu0 %999 }
 0x169   :  { %v1005_v26 = vsel %vm221_vm2, %v1000_v31, %v1002_v43  ;;  %v1004_v27 = vsel %vm221_vm2, %v998_v41, %v1000_v31 }
 0x16b   :  { %v3179_v52 = vpop.permute.xlu1 %1151 }
 0x16c   :  { %v3167_v32 = vpop.permute.xlu0 %1066 }
 0x16d   :  { %v1082_v33 = vmul.f32 0.0, %v3167_v32 }
 0x16f   :  { %1092 = vrot.lane.b32.xlu1 %v1082_v33, %s2730_s19  ;;  %v1219_v23 = vpop.permute.xlu1 %1218 }
 0x170   :  { %v1071_v44 = vpop.permute.xlu0 %1070 }
 0x171   :  { %v1076_v39 = vsel %vm295_vm3, %v1071_v44, %v1073_v47  ;;  %v1075_v31 = vsel %vm295_vm3, %v1069_v45, %v1071_v44 }
 0x173   :  { %v1223_v24 = vpop.permute.xlu1 %1222 }
 0x174   :  { %v3171_v46 = vpop.permute.xlu0 %1145 }
 0x178   :  { %v3173_v48 = vpop.permute.xlu0 %1149 }
 0x179   :  { %v1154_v44 = vsel %vm324_vm4, %v3175_v49, %v3173_v48 }
 0x17c   :  { %v3177_v50 = vpop.permute.xlu0 %1216 }
 0x180   :  { %v3181_v53 = vpop.permute.xlu0 %1220 }
 0x184   :  { %v3198_v1 = vpop.permute.xlu0 %1287 }
 0x216   :  { %v744_v35 = vpop.f32.mrb[0].mxu0 }
 0x217   :  { %v745_v51 = vadd.f32 %v744_v35, %v672_v25  ;;  %v746_v34 = vpop.f32.mrb[1].mxu0 }
 0x218   :  { %v747_v54 = vadd.f32 %v746_v34, %v672_v25 }
 0x219   :  { %v3183_v14 = vmax.f32 %v745_v51, 0.0 }
 0x21a   :  { %v815_v55 = vpop.f32.mrb[0].mxu1  ;;  %v3185_v58 = vmax.f32 %v747_v54, 0.0 }
 0x21b   :  { %v816_v59 = vadd.f32 %v815_v55, %v672_v25  ;;  %v817_v60 = vpop.f32.mrb[1].mxu1  ;;  %v1232_v63 = vmul.f32 %v3177_v50, %v3183_v14  ;;  %v1161_v56 = vmul.f32 %v3171_v46, %v3183_v14  ;;  %v1303_v10 = vmul.f32 %v3198_v1, %v3183_v14  ;;  %v1292_v55 = vpop.permute.xlu0 %1291 }
 0x21c   :  { %v818_v37 = vadd.f32 %v817_v60, %v672_v25  ;;  %v870_v42 = vmul.f32 %v861_v0, %v3183_v14  ;;  %v871_v16 = vmul.f32 %v862_v13, %v3185_v58  ;;  %v941_v20 = vmul.f32 %v932_v19, %v3183_v14 }
 0x21d   :  { %v3191_v57 = vmax.f32 %v816_v59, 0.0  ;;  %1242 = vrot.lane.b32.xlu1 %v1232_v63, %s2728_s13  ;;  %1171 = vrot.lane.b32.xlu0 %v1161_v56, %s2729_s16  ;;  %v942_v21 = vmul.f32 %v933_v62, %v3185_v58  ;;  %v1003_v25 = vsel %vm221_vm2, %v996_v28, %v998_v41  ;;  %v1074_v28 = vsel %vm295_vm3, %v3167_v32, %v1069_v45 }
 0x21e   :  { %v3200_v9 = vmax.f32 %v818_v37, 0.0  ;;  %v2585_v11 = vpack.i.bf16 %v871_v16, %v870_v42  ;;  %v1012_v22 = vmul.f32 %v1003_v25, %v3183_v14  ;;  %v1083_v34 = vmul.f32 %v1074_v28, %v3183_v14 }
 0x21f   :  { %v872_v12 = vmul.f32 %v863_v2, %v3191_v57  ;;  %v943_v15 = vmul.f32 %v934_v61, %v3191_v57  ;;  %v1014_v8 = vmul.f32 %v1005_v26, %v3191_v57  ;;  %v2595_v33 = vpack.i.bf16 %v942_v21, %v941_v20 }
 0x220   :  { %v873_v17 = vmul.f32 %v860_v29, %v3200_v9  ;;  %v944_v18 = vmul.f32 %v931_v40, %v3200_v9  ;;  %v1015_v30 = vmul.f32 %v1002_v43, %v3200_v9  ;;  %v1013_v29 = vmul.f32 %v1004_v27, %v3185_v58  ;;  %v1290_v40 = vpop.permute.xlu1 %1289 }
 0x221   :  { %1313 = vrot.lane.b32.xlu0 %v1303_v10, %s2727_s10  ;;  %v1085_v43 = vmul.f32 %v1076_v39, %v3191_v57  ;;  %v1086_v35 = vmul.f32 %v1073_v47, %v3200_v9  ;;  %v1084_v54 = vmul.f32 %v1075_v31, %v3185_v58  ;;  %v1155_v32 = vsel %vm324_vm4, %v3173_v48, %v3179_v52 }
 0x222   :  { %v2590_v36 = vpack.i.bf16 %v873_v17, %v872_v12  ;;  %v2600_v7 = vpack.i.bf16 %v944_v18, %v943_v15  ;;  %v2610_v41 = vpack.i.bf16 %v1015_v30, %v1014_v8  ;;  %v2605_v51 = vpack.i.bf16 %v1013_v29, %v1012_v22  ;;  %v829_v22 = vld [vmem:[%s3628_s6] sm:$0xff] }
 0x223   :  { %v1165_v45 = vmul.f32 0.0, %v3179_v52  ;;  %v2620_v47 = vpack.i.bf16 %v1086_v35, %v1085_v43  ;;  %v1164_v59 = vmul.f32 %v1155_v32, %v3200_v9  ;;  %v1225_v60 = vsel %vm250_vm5, %v1219_v23, %v3181_v53  ;;  %v1607_v29 = vld [vmem:[%s3624_s1] ss:$8 sm:$0xf] }
 0x224   :  { %2591 = vrot.lane.b32.xlu1 %v2590_v36, %s2733_s28  ;;  %v2615_v63 = vpack.i.bf16 %v1084_v54, %v1083_v34  ;;  %v1163_v56 = vmul.f32 %v1154_v44, %v3191_v57  ;;  %v1153_v37 = vsel %vm324_vm4, %v3171_v46, %v3175_v49  ;;  %v1226_v0 = vsel %vm250_vm5, %v3181_v53, %v1223_v24  ;;  %v1294_v13 = vpop.permute.xlu1 %1293  ;;  %v1359_v46 = vpop.permute.xlu0 %1358  ;;  %v2398_v54 = vld [vmem:[%s3624_s1 + $0x2] ss:$8 sm:$0xf] }
 0x225   :  { %2586 = vrot.lane.b32.xlu0 %v2585_v11, %s2733_s28  ;;  %v1224_v48 = vsel %vm250_vm5, %v3177_v50, %v1219_v23  ;;  %v1162_v52 = vmul.f32 %v1153_v37, %v3185_v58  ;;  %v2630_v2 = vpack.i.bf16 %v1165_v45, %v1164_v59  ;;  %v1234_v10 = vmul.f32 %v1225_v60, %v3191_v57  ;;  %v2400_v37 = vld [vmem:[%s3624_s1 + $0x5] ss:$8 sm:$0xf] }
 0x226   :  { %v1236_v12 = vmul.f32 0.0, %v1223_v24  ;;  %v1296_v42 = vsel %vm176_vm6, %v1290_v40, %v1292_v55  ;;  %v1235_v53 = vmul.f32 %v1226_v0, %v3200_v9  ;;  %v1297_v16 = vsel %vm176_vm6, %v1292_v55, %v1294_v13 }
 0x227   :  { %v2625_v49 = vpack.i.bf16 %v1163_v56, %v1162_v52  ;;  %v1233_v50 = vmul.f32 %v1224_v48, %v3185_v58  ;;  %v1295_v23 = vsel %vm176_vm6, %v3198_v1, %v1290_v40  ;;  %v1305_v61 = vmul.f32 %v1296_v42, %v3191_v57 }
 0x228   :  { %2601 = vrot.lane.b32.xlu1 %v2600_v7, %s2732_s25  ;;  %v1361_v17 = vpop.permute.xlu1 %1360  ;;  %v1307_v62 = vmul.f32 0.0, %v1294_v13  ;;  %v2640_v36 = vpack.i.bf16 %v1236_v12, %v1235_v53  ;;  %v1306_v15 = vmul.f32 %v1297_v16, %v3200_v9  ;;  %v1304_v18 = vmul.f32 %v1295_v23, %v3185_v58  ;;  %v1363_v11 = vpop.permute.xlu0 %1362 }
 0x229   :  { %2596 = vrot.lane.b32.xlu0 %v2595_v33, %s2732_s25  ;;  %v2635_v19 = vpack.i.bf16 %v1234_v10, %v1233_v50  ;;  %v1366_v1 = vsel %vm102_vm7, %v1359_v46, %v1361_v17  ;;  %v1367_v24 = vsel %vm102_vm7, %v1361_v17, %v1363_v11  ;;  %v1374_v33 = vmul.f32 %v1359_v46, %v3183_v14  ;;  %v2403_v17 = vld [vmem:[%s3624_s1 + $0x20] ss:$8 sm:$0xf] }
 0x22a   :  { %v2645_v20 = vpack.i.bf16 %v1305_v61, %v1304_v18  ;;  %v2650_v21 = vpack.i.bf16 %v1307_v62, %v1306_v15  ;;  %v1375_v26 = vmul.f32 %v1366_v1, %v3185_v58  ;;  %v1376_v27 = vmul.f32 %v1367_v24, %v3191_v57 }
 0x22b   :  { %v1612_v28 = vrot.slane %v1607_v29, %v2786_v4  ;;  %v1616_v39 = vrot.slane %v1607_v29, %v2790_v6  ;;  %v1620_v31 = vrot.slane %v1607_v29, %v2784_v3  ;;  %v1624_v40 = vrot.slane %v1607_v29, %v2788_v5 }
 0x22c   :  { %2611 = vrot.lane.b32.xlu1 %v2610_v41, %s2731_s22  ;;  %v1365_v25 = vpop.permute.xlu1 %1364  ;;  %v2397_v41 = vld [vmem:[%s3624_s1 + $0x1] ss:$8 sm:$0xf]  ;;  %v1754_v32 = vrot.slane %v2398_v54, %v2786_v4  ;;  %v1758_v55 = vrot.slane %v2398_v54, %v2790_v6  ;;  %v1762_v44 = vrot.slane %v2398_v54, %v2784_v3  ;;  %v1766_v45 = vrot.slane %v2398_v54, %v2788_v5 }
 0x22d   :  { %2606 = vrot.lane.b32.xlu0 %v2605_v51, %s2731_s22  ;;  %v1368_v7 = vsel %vm102_vm7, %v1363_v11, %v1365_v25  ;;  %v1378_v30 = vmul.f32 0.0, %v1365_v25  ;;  %v1683_v43 = vrot.slane %v2397_v41, %v2786_v4  ;;  %v1687_v35 = vrot.slane %v2397_v41, %v2790_v6 }
 0x22e   :  { %v1377_v8 = vmul.f32 %v1368_v7, %v3200_v9  ;;  %v1691_v51 = vrot.slane %v2397_v41, %v2784_v3  ;;  %v1695_v34 = vrot.slane %v2397_v41, %v2788_v5  ;;  %v1904_v0 = vrot.slane %v2400_v37, %v2786_v4 }
 0x22f   :  { %v1908_v13 = vrot.slane %v2400_v37, %v2790_v6  ;;  %v1912_v48 = vrot.slane %v2400_v37, %v2784_v3  ;;  %v1916_v52 = vrot.slane %v2400_v37, %v2788_v5  ;;  %v2121_v61 = vrot.slane %v2403_v17, %v2790_v6 }
 0x230   :  { %2621 = vrot.lane.b32.xlu1 %v2620_v47, %s2730_s19  ;;  %v2399_v47 = vld [vmem:[%s3624_s1 + $0x3] ss:$8 sm:$0xf]  ;;  %v2125_v62 = vrot.slane %v2403_v17, %v2784_v3  ;;  %v2129_v15 = vrot.slane %v2403_v17, %v2788_v5  ;;  %v951_v18 = vpop.permute.xlu1 %950 }
 0x231   :  { %2616 = vrot.lane.b32.xlu0 %v2615_v63, %s2730_s19  ;;  %v1825_v59 = vrot.slane %v2399_v47, %v2786_v4  ;;  %v1829_v60 = vrot.slane %v2399_v47, %v2790_v6  ;;  %v1833_v63 = vrot.slane %v2399_v47, %v2784_v3  ;;  %v1837_v56 = vrot.slane %v2399_v47, %v2788_v5 }
 0x234   :  { %2631 = vrot.lane.b32.xlu1 %v2630_v2, %s2729_s16  ;;  %v2401_v2 = vld [vmem:[%s3624_s1 + $0x6] ss:$8 sm:$0xf] }
 0x235   :  { %2626 = vrot.lane.b32.xlu0 %v2625_v49, %s2729_s16  ;;  %v1975_v10 = vrot.slane %v2401_v2, %v2786_v4  ;;  %v1979_v12 = vrot.slane %v2401_v2, %v2790_v6  ;;  %v1983_v42 = vrot.slane %v2401_v2, %v2784_v3  ;;  %v1987_v46 = vrot.slane %v2401_v2, %v2788_v5  ;;  %v2402_v49 = vld [vmem:[%s3624_s1 + $0x7] ss:$8 sm:$0xf] }
 0x236   :  { %v2046_v53 = vrot.slane %v2402_v49, %v2786_v4  ;;  %v2050_v16 = vrot.slane %v2402_v49, %v2790_v6  ;;  %v2054_v50 = vrot.slane %v2402_v49, %v2784_v3  ;;  %v2058_v23 = vrot.slane %v2402_v49, %v2788_v5 }
 0x238   :  { %2636 = vrot.lane.b32.xlu1 %v2635_v19, %s2728_s13  ;;  %v2117_v19 = vrot.slane %v2403_v17, %v2786_v4  ;;  %v1093_v4 = vpop.permute.xlu1 %1092 }
 0x239   :  { %2641 = vrot.lane.b32.xlu0 %v2640_v36, %s2728_s13  ;;  %v880_v36 = vpop.permute.xlu0 %879 }
 0x23c   :  { %2646 = vrot.lane.b32.xlu1 %v2645_v20, %s2727_s10 }
 0x23d   :  { %2651 = vrot.lane.b32.xlu0 %v2650_v21, %s2727_s10  ;;  %v1022_v11 = vpop.permute.xlu0 %1021 }
 0x240   :  { %1386 = vrot.lane.b32.xlu1 %v1375_v26, %s2726_s29 }
 0x241   :  { %1388 = vrot.lane.b32.xlu0 %v1376_v27, %s2726_s29 }
 0x244   :  { %1390 = vrot.lane.b32.xlu1 %v1377_v8, %s2726_s29 }
 0x245   :  { %1392 = vrot.lane.b32.xlu0 %v1378_v30, %s2726_s29 }
 0x248   :  { %1384 = vrot.lane.b32.xlu1 %v1374_v33, %s2726_s29 }
 0x249   :  { %1444 = vperm.xlu0 %2584, %v829_v22  }
 0x24c   :  { %1625 = vrot.lane.b32.xlu1 %v1612_v28, %s2726_s29 }
 0x24d   :  { %1627 = vrot.lane.b32.xlu0 %v1616_v39, %s2726_s29 }
 0x250   :  { %1629 = vrot.lane.b32.xlu1 %v1620_v31, %s2726_s29 }
 0x251   :  { %1631 = vrot.lane.b32.xlu0 %v1624_v40, %s2726_s29 }
 0x254   :  { %1696 = vrot.lane.b32.xlu1 %v1683_v43, %s2727_s10 }
 0x255   :  { %1698 = vrot.lane.b32.xlu0 %v1687_v35, %s2727_s10 }
 0x258   :  { %1700 = vrot.lane.b32.xlu1 %v1691_v51, %s2727_s10 }
 0x259   :  { %1702 = vrot.lane.b32.xlu0 %v1695_v34, %s2727_s10 }
 0x25c   :  { %1767 = vrot.lane.b32.xlu1 %v1754_v32, %s2728_s13 }
 0x25d   :  { %1769 = vrot.lane.b32.xlu0 %v1758_v55, %s2728_s13 }
 0x260   :  { %1771 = vrot.lane.b32.xlu1 %v1762_v44, %s2728_s13 }
 0x261   :  { %1773 = vrot.lane.b32.xlu0 %v1766_v45, %s2728_s13 }
 0x264   :  { %1838 = vrot.lane.b32.xlu1 %v1825_v59, %s2729_s16 }
 0x265   :  { %1840 = vrot.lane.b32.xlu0 %v1829_v60, %s2729_s16 }
 0x268   :  { %1842 = vrot.lane.b32.xlu1 %v1833_v63, %s2729_s16 }
 0x269   :  { %1844 = vrot.lane.b32.xlu0 %v1837_v56, %s2729_s16 }
 0x26c   :  { %1917 = vrot.lane.b32.xlu1 %v1904_v0, %s2730_s19 }
 0x26d   :  { %1919 = vrot.lane.b32.xlu0 %v1908_v13, %s2730_s19 }
 0x270   :  { %1921 = vrot.lane.b32.xlu1 %v1912_v48, %s2730_s19 }
 0x271   :  { %1923 = vrot.lane.b32.xlu0 %v1916_v52, %s2730_s19 }
 0x274   :  { %1988 = vrot.lane.b32.xlu1 %v1975_v10, %s2731_s22 }
 0x275   :  { %1990 = vrot.lane.b32.xlu0 %v1979_v12, %s2731_s22 }
 0x278   :  { %1992 = vrot.lane.b32.xlu1 %v1983_v42, %s2731_s22 }
 0x279   :  { %1994 = vrot.lane.b32.xlu0 %v1987_v46, %s2731_s22 }
 0x27c   :  { %2059 = vrot.lane.b32.xlu1 %v2046_v53, %s2732_s25 }
 0x27d   :  { %2061 = vrot.lane.b32.xlu0 %v2050_v16, %s2732_s25 }
 0x280   :  { %2063 = vrot.lane.b32.xlu1 %v2054_v50, %s2732_s25 }
 0x281   :  { %2065 = vrot.lane.b32.xlu0 %v2058_v23, %s2732_s25 }
 0x284   :  { %2130 = vrot.lane.b32.xlu1 %v2117_v19, %s2733_s28 }
 0x285   :  { %2132 = vrot.lane.b32.xlu0 %v2121_v61, %s2733_s28 }
 0x288   :  { %2134 = vrot.lane.b32.xlu1 %v2125_v62, %s2733_s28 }
 0x289   :  { %2136 = vrot.lane.b32.xlu0 %v2129_v15, %s2733_s28 }
 0x28f   :  { %v3377_v20 = vpop.permute.xlu0 %1171  ;;  %v3379_v1 = vpop.permute.xlu1 %1242 }
 0x293   :  { %v3381_v6 = vpop.permute.xlu0 %1313 }
 0x296   :  { %v2592_v21 = vpop.permute.xlu1 %2591 }
 0x297   :  { %v2587_v3 = vpop.permute.xlu0 %2586  ;;  %v2594_v24 = vunpack.i.h.bf16 %v2592_v21  ;;  %v2593_v25 = vunpack.i.l.bf16 %v2592_v21 }
 0x298   :  { %v2589_v26 = vunpack.i.h.bf16 %v2587_v3  ;;  %v2588_v27 = vunpack.i.l.bf16 %v2587_v3 }
 0x299   :  { %v892_v39 = vsel %vm102_vm7, %v2593_v25, %v2594_v24 }
 0x29a   :  { %v2602_v5 = vpop.permute.xlu1 %2601  ;;  %v891_v29 = vsel %vm102_vm7, %v2589_v26, %v2593_v25  ;;  %v889_v28 = vsel %vm102_vm7, %v880_v36, %v2588_v27  ;;  %v890_v55 = vsel %vm102_vm7, %v2588_v27, %v2589_v26 }
 0x29b   :  { %v2604_v7 = vunpack.i.h.bf16 %v2602_v5  ;;  %v2603_v8 = vunpack.i.l.bf16 %v2602_v5  ;;  %v2597_v30 = vpop.permute.xlu0 %2596 }
 0x29c   :  { %v2599_v33 = vunpack.i.h.bf16 %v2597_v30  ;;  %v2598_v22 = vunpack.i.l.bf16 %v2597_v30 }
 0x29d   :  { %v963_v31 = vsel %vm176_vm6, %v2603_v8, %v2604_v7 }
 0x29e   :  { %v962_v40 = vsel %vm176_vm6, %v2599_v33, %v2603_v8  ;;  %v960_v41 = vsel %vm176_vm6, %v951_v18, %v2598_v22  ;;  %v2612_v43 = vpop.permute.xlu1 %2611  ;;  %v2456_v35 = vpack.c.bf16 %v963_v31, %v892_v39  ;;  %v961_v51 = vsel %vm176_vm6, %v2598_v22, %v2599_v33 }
 0x29f   :  { %v2442_v34 = vpack.c.bf16 %v960_v41, %v889_v28  ;;  %v2458_v54 = vpack.c.bf16 %v962_v40, %v891_v29  ;;  %v2607_v32 = vpop.permute.xlu0 %2606  ;;  %v2614_v44 = vunpack.i.h.bf16 %v2612_v43  ;;  %v2613_v45 = vunpack.i.l.bf16 %v2612_v43 }
 0x2a0   :  { %2457 = vmatprep.subr.bf16.mxu1 %v2456_v35  ;;  %v2440_v47 = vpack.c.bf16 %v961_v51, %v890_v55  ;;  %v2609_v59 = vunpack.i.h.bf16 %v2607_v32  ;;  %v2608_v60 = vunpack.i.l.bf16 %v2607_v32 }
 0x2a1   :  { %2459 = vmatpush1.bf16.msra.mxu1 %v2458_v54  ;;  %v1034_v52 = vsel %vm250_vm5, %v2613_v45, %v2614_v44 }
 0x2a2   :  { %2441 = vmatprep.subr.bf16.mxu0 %v2440_v47  ;;  %v2622_v63 = vpop.permute.xlu1 %2621  ;;  %v1033_v2 = vsel %vm250_vm5, %v2609_v59, %v2613_v45  ;;  %v1031_v10 = vsel %vm250_vm5, %v1022_v11, %v2608_v60  ;;  %v1032_v42 = vsel %vm250_vm5, %v2608_v60, %v2609_v59 }
 0x2a3   :  { %v2624_v56 = vunpack.i.h.bf16 %v2622_v63  ;;  %v2623_v37 = vunpack.i.l.bf16 %v2622_v63  ;;  %2443 = vmatpush1.bf16.msra.mxu0 %v2442_v34  ;;  %v2617_v0 = vpop.permute.xlu0 %2616 }
 0x2a4   :  { %v2619_v13 = vunpack.i.h.bf16 %v2617_v0  ;;  %v2618_v48 = vunpack.i.l.bf16 %v2617_v0  ;;  %v828_v0 = vld [vmem:[%s3629_s3] sm:$0xff] }
 0x2a5   :  { %v1105_v12 = vsel %vm324_vm4, %v2623_v37, %v2624_v56 }
 0x2a6   :  { %v1104_v46 = vsel %vm324_vm4, %v2619_v13, %v2623_v37  ;;  %v1102_v49 = vsel %vm324_vm4, %v1093_v4, %v2618_v48  ;;  %v2632_v53 = vpop.permute.xlu1 %2631  ;;  %v2460_v16 = vpack.c.bf16 %v1105_v12, %v1034_v52  ;;  %v1103_v50 = vsel %vm324_vm4, %v2618_v48, %v2619_v13 }
 0x2a7   :  { %v2446_v23 = vpack.c.bf16 %v1102_v49, %v1031_v10  ;;  %v2462_v17 = vpack.c.bf16 %v1104_v46, %v1033_v2  ;;  %v2634_v19 = vunpack.i.h.bf16 %v2632_v53  ;;  %v2633_v61 = vunpack.i.l.bf16 %v2632_v53  ;;  %v2627_v62 = vpop.permute.xlu0 %2626 }
 0x2a8   :  { %v2629_v36 = vunpack.i.h.bf16 %v2627_v62  ;;  %v2628_v15 = vunpack.i.l.bf16 %v2627_v62  ;;  %2461 = vmatprep.subr.bf16.mxu1 %v2460_v16  ;;  %v2444_v18 = vpack.c.bf16 %v1103_v50, %v1032_v42 }
 0x2a9   :  { %2463 = vmatpush1.bf16.msra.mxu1 %v2462_v17  ;;  %v1184_v11 = vsel %vm295_vm3, %v2633_v61, %v2634_v19 }
 0x2aa   :  { %v1183_v21 = vsel %vm295_vm3, %v2629_v36, %v2633_v61  ;;  %v1181_v4 = vsel %vm295_vm3, %v3377_v20, %v2628_v15  ;;  %2445 = vmatprep.subr.bf16.mxu0 %v2444_v18  ;;  %v2637_v3 = vpop.permute.xlu1 %2636  ;;  %v2464_v24 = vpack.c.bf16 %v1184_v11, %v3200_v9  ;;  %v1182_v25 = vsel %vm295_vm3, %v2628_v15, %v2629_v36 }
 0x2ab   :  { %v2466_v26 = vpack.c.bf16 %v1183_v21, %v3191_v57  ;;  %v2450_v27 = vpack.c.bf16 %v1181_v4, %v3183_v14  ;;  %2447 = vmatpush1.bf16.msra.mxu0 %v2446_v23  ;;  %v2642_v5 = vpop.permute.xlu0 %2641  ;;  %v2639_v7 = vunpack.i.h.bf16 %v2637_v3  ;;  %v2638_v8 = vunpack.i.l.bf16 %v2637_v3 }
 0x2ac   :  { %2465 = vmatprep.subr.bf16.mxu1 %v2464_v24  ;;  %v2448_v30 = vpack.c.bf16 %v1182_v25, %v3185_v58  ;;  %v2644_v33 = vunpack.i.h.bf16 %v2642_v5  ;;  %v2643_v22 = vunpack.i.l.bf16 %v2642_v5 }
 0x2ad   :  { %2467 = vmatpush1.bf16.msra.mxu1 %v2466_v26  ;;  %v1252_v31 = vsel %vm221_vm2, %v3379_v1, %v2638_v8  ;;  %v1253_v43 = vsel %vm221_vm2, %v2638_v8, %v2639_v7 }
 0x2ae   :  { %2449 = vmatprep.subr.bf16.mxu0 %v2448_v30  ;;  %v2647_v20 = vpop.permute.xlu1 %2646  ;;  %v1254_v35 = vsel %vm221_vm2, %v2639_v7, %v2643_v22  ;;  %v1255_v54 = vsel %vm221_vm2, %v2643_v22, %v2644_v33 }
 0x2af   :  { %v2649_v29 = vunpack.i.h.bf16 %v2647_v20  ;;  %v2648_v28 = vunpack.i.l.bf16 %v2647_v20  ;;  %2451 = vmatpush1.bf16.msra.mxu0 %v2450_v27  ;;  %v2652_v39 = vpop.permute.xlu0 %2651 }
 0x2b0   :  { %v2654_v40 = vunpack.i.h.bf16 %v2652_v39  ;;  %v2653_v41 = vunpack.i.l.bf16 %v2652_v39 }
 0x2b1   :  { %v1323_v51 = vsel %vm147_vm1, %v3381_v6, %v2648_v28  ;;  %v1324_v34 = vsel %vm147_vm1, %v2648_v28, %v2649_v29 }
 0x2b2   :  { %v2454_v32 = vpack.c.bf16 %v1323_v51, %v1252_v31  ;;  %v1325_v55 = vsel %vm147_vm1, %v2649_v29, %v2653_v41  ;;  %v1387_v44 = vpop.permute.xlu1 %1386  ;;  %v2452_v45 = vpack.c.bf16 %v1324_v34, %v1253_v43  ;;  %v1326_v1 = vsel %vm147_vm1, %v2653_v41, %v2654_v40 }
 0x2b3   :  { %v2470_v47 = vpack.c.bf16 %v1325_v55, %v1254_v35  ;;  %v1389_v59 = vpop.permute.xlu0 %1388  ;;  %v2468_v60 = vpack.c.bf16 %v1326_v1, %v1255_v54 }
 0x2b4   :  { %2453 = vmatprep.subr.bf16.mxu0 %v2452_v45  ;;  %v1395_v63 = vsel %vm73_vm0, %v1387_v44, %v1389_v59 }
 0x2b5   :  { %2455 = vmatpush1.bf16.msra.mxu0 %v2454_v32  ;;  %2469 = vmatprep.subr.bf16.mxu1 %v2468_v60 }
 0x2b6   :  { %v1391_v6 = vpop.permute.xlu1 %1390  ;;  %1466 = vmatprep.subr.mxu0 %v1395_v63  ;;  %2471 = vmatpush1.bf16.msra.mxu1 %v2470_v47 }
 0x2b7   :  { %v1393_v56 = vpop.permute.xlu0 %1392  ;;  %v1396_v13 = vsel %vm73_vm0, %v1389_v59, %v1391_v6 }
 0x2b8   :  { %v1397_v37 = vsel %vm73_vm0, %v1391_v6, %v1393_v56 }
 0x2b9   :  { %1537 = vmatprep.subr.mxu1 %v1397_v37 }
 0x2ba   :  { %v1385_v48 = vpop.permute.xlu1 %1384  ;;  %1538 = vmatpush1.msra.mxu1 %v1396_v13 }
 0x2bb   :  { %v1394_v52 = vsel %vm73_vm0, %v1385_v48, %v1387_v44  ;;  %2396 = vmatmul.mubr.msk.f32.vlgmr.msra.gmra.mrb[2].mxu1 %vm674_vm8, %v828_v0 }
 0x2bc   :  { %1467 = vmatpush1.msra.mxu0 %v1394_v52  ;;  %2357 = vmatprep.mubr.f32.mxu1 %v2734_v38 }
 0x2bd   :  { %2395 = vmatmul.mubr.msk.f32.vlgmr.msra.gmra.mrb[2].mxu0 %vm674_vm8, %v828_v0 }
 0x2be   :  { %v1626_v2 = vpop.permute.xlu1 %1625  ;;  %2286 = vmatprep.mubr.f32.mxu0 %v2734_v38 }
 0x2bf   :  { %v1641_v10 = vmul.f32 0.0, %v1626_v2 }
 0x2c1   :  { %1651 = vrot.lane.b32.xlu1 %v1641_v10, %s2733_s28 }
 0x2c2   :  { %v1630_v12 = vpop.permute.xlu1 %1629 }
 0x2c6   :  { %v1697_v42 = vpop.permute.xlu1 %1696 }
 0x2c7   :  { %v1712_v46 = vmul.f32 0.0, %v1697_v42 }
 0x2c8   :  { %v1445_v38 = vpop.permute.xlu0 %1444 }
 0x2c9   :  { %1722 = vrot.lane.b32.xlu0 %v1712_v46, %s2732_s25 }
 0x2ca   :  { %v1701_v49 = vpop.permute.xlu1 %1700 }
 0x2cc   :  { %v1628_v19 = vpop.permute.xlu0 %1627 }
 0x2cd   :  { %v1633_v40 = vsel %vm73_vm0, %v1626_v2, %v1628_v19  ;;  %v1634_v35 = vsel %vm73_vm0, %v1628_v19, %v1630_v12 }
 0x2ce   :  { %v1768_v53 = vpop.permute.xlu1 %1767 }
 0x2cf   :  { %v1783_v16 = vmul.f32 0.0, %v1768_v53 }
 0x2d0   :  { %v1632_v61 = vpop.permute.xlu0 %1631 }
 0x2d1   :  { %1793 = vrot.lane.b32.xlu1 %v1783_v16, %s2731_s22  ;;  %v1635_v41 = vsel %vm73_vm0, %v1630_v12, %v1632_v61 }
 0x2d2   :  { %v3432_v50 = vpop.permute.xlu1 %1771 }
 0x2d4   :  { %v1699_v62 = vpop.permute.xlu0 %1698 }
 0x2d5   :  { %v1704_v51 = vsel %vm147_vm1, %v1697_v42, %v1699_v62  ;;  %v1705_v47 = vsel %vm147_vm1, %v1699_v62, %v1701_v49 }
 0x2d6   :  { %v3434_v23 = vpop.permute.xlu1 %1838 }
 0x2d7   :  { %v1854_v17 = vmul.f32 0.0, %v3434_v23 }
 0x2d8   :  { %v1703_v36 = vpop.permute.xlu0 %1702 }
 0x2d9   :  { %1864 = vrot.lane.b32.xlu0 %v1854_v17, %s2730_s19  ;;  %v1706_v59 = vsel %vm147_vm1, %v1701_v49, %v1703_v36 }
 0x2da   :  { %v3438_v11 = vpop.permute.xlu1 %1842 }
 0x2dc   :  { %v1770_v15 = vpop.permute.xlu0 %1769 }
 0x2dd   :  { %v1775_v60 = vsel %vm221_vm2, %v1768_v53, %v1770_v15  ;;  %v1776_v6 = vsel %vm221_vm2, %v1770_v15, %v3432_v50 }
 0x2de   :  { %v3442_v4 = vpop.permute.xlu1 %1917 }
 0x2e0   :  { %v1774_v18 = vpop.permute.xlu0 %1773 }
 0x2e1   :  { %v1777_v16 = vsel %vm221_vm2, %v3432_v50, %v1774_v18 }
 0x2e2   :  { %v3444_v24 = vpop.permute.xlu1 %1921 }
 0x2e4   :  { %v3440_v21 = vpop.permute.xlu0 %1840 }
 0x2e5   :  { %v1846_v50 = vsel %vm295_vm3, %v3434_v23, %v3440_v21 }
 0x2e6   :  { %v3448_v26 = vpop.permute.xlu1 %1988 }
 0x2e8   :  { %v1845_v3 = vpop.permute.xlu0 %1844 }
 0x2ea   :  { %v3452_v28 = vpop.permute.xlu1 %1992 }
 0x2ec   :  { %v3446_v25 = vpop.permute.xlu0 %1919 }
 0x2ed   :  { %v1925_v23 = vsel %vm324_vm4, %v3442_v4, %v3446_v25 }
 0x2ee   :  { %v2060_v0 = vpop.permute.xlu1 %2059 }
 0x2f0   :  { %v1924_v5 = vpop.permute.xlu0 %1923 }
 0x2f4   :  { %v1991_v32 = vpop.permute.xlu0 %1990 }
 0x2f8   :  { %v1995_v49 = vpop.permute.xlu0 %1994 }
 0x2fc   :  { %v2062_v62 = vpop.permute.xlu0 %2061 }
 0x38e   :  { %v1587_v27 = vpop.f32.mrb[2].mxu1 }
 0x38f   :  { %v1588_v7 = vadd.f32 %v1587_v27, %v1445_v38  ;;  %v1589_v8 = vpop.f32.mrb[3].mxu1 }
 0x390   :  { %v1590_v30 = vadd.f32 %v1589_v8, %v1445_v38  ;;  %v1516_v33 = vpop.f32.mrb[2].mxu0  ;;  %v1937_v8 = vmul.f32 0.0, %v1924_v5 }
 0x391   :  { %v3450_v22 = vmax.f32 %v1588_v7, 0.0  ;;  %v1517_v20 = vadd.f32 %v1516_v33, %v1445_v38  ;;  %v1518_v29 = vpop.f32.mrb[3].mxu0  ;;  %v1927_v7 = vsel %vm324_vm4, %v3444_v24, %v1924_v5 }
 0x392   :  { %v3454_v39 = vmax.f32 %v1590_v30, 0.0  ;;  %v1519_v31 = vadd.f32 %v1518_v29, %v1445_v38  ;;  %v2064_v29 = vpop.permute.xlu1 %2063 }
 0x393   :  { %v3458_v43 = vmax.f32 %v1517_v20, 0.0  ;;  %v1644_v54 = vmul.f32 %v1635_v41, %v3450_v22  ;;  %v1715_v13 = vmul.f32 %v1706_v59, %v3450_v22  ;;  %v1786_v38 = vmul.f32 %v1777_v16, %v3450_v22  ;;  %v1601_v16 = vld [vmem:[%s3630_s7] sm:$0xff] }
 0x394   :  { %v3462_v34 = vmax.f32 %v1519_v31, 0.0  ;;  %v1645_v45 = vmul.f32 %v1632_v61, %v3454_v39  ;;  %v1716_v48 = vmul.f32 %v1703_v36, %v3454_v39  ;;  %v1787_v19 = vmul.f32 %v1774_v18, %v3454_v39  ;;  %v2066_v31 = vpop.permute.xlu0 %2065 }
 0x395   :  { %v2004_v55 = vmul.f32 %v3448_v26, %v3458_v43  ;;  %v1933_v44 = vmul.f32 %v3442_v4, %v3458_v43  ;;  %v1642_v1 = vmul.f32 %v1633_v40, %v3458_v43  ;;  %v1713_v56 = vmul.f32 %v1704_v51, %v3458_v43 }
 0x396   :  { %v1643_v63 = vmul.f32 %v1634_v35, %v3462_v34  ;;  %v1714_v37 = vmul.f32 %v1705_v47, %v3462_v34  ;;  %v1784_v2 = vmul.f32 %v1775_v60, %v3458_v43  ;;  %v2660_v10 = vpack.i.bf16 %v1645_v45, %v1644_v54  ;;  %v2131_v45 = vpop.permute.xlu1 %2130 }
 0x397   :  { %2014 = vrot.lane.b32.xlu0 %v2004_v55, %s2728_s13  ;;  %1943 = vrot.lane.b32.xlu1 %v1933_v44, %s2729_s16  ;;  %v2075_v12 = vmul.f32 %v2060_v0, %v3458_v43  ;;  %v1785_v46 = vmul.f32 %v1776_v6, %v3462_v34  ;;  %v2670_v17 = vpack.i.bf16 %v1716_v48, %v1715_v13  ;;  %v2008_v55 = vmul.f32 0.0, %v1995_v49 }
 0x398   :  { %v2655_v52 = vpack.i.bf16 %v1643_v63, %v1642_v1  ;;  %v2665_v42 = vpack.i.bf16 %v1714_v37, %v1713_v56  ;;  %v1848_v61 = vsel %vm295_vm3, %v3438_v11, %v1845_v3  ;;  %v2680_v36 = vpack.i.bf16 %v1787_v19, %v1786_v38  ;;  %v2133_v1 = vpop.permute.xlu0 %2132 }
 0x399   :  { %v2675_v53 = vpack.i.bf16 %v1785_v46, %v1784_v2  ;;  %v1857_v15 = vmul.f32 %v1848_v61, %v3450_v22  ;;  %v1858_v27 = vmul.f32 %v1845_v3, %v3454_v39  ;;  %v1847_v18 = vsel %vm295_vm3, %v3440_v21, %v3438_v11 }
 0x39a   :  { %v1936_v33 = vmul.f32 %v1927_v7, %v3454_v39  ;;  %v1855_v3 = vmul.f32 %v1846_v50, %v3458_v43  ;;  %v1856_v20 = vmul.f32 %v1847_v18, %v3462_v34  ;;  %v1996_v11 = vsel %vm250_vm5, %v3448_v26, %v1991_v32  ;;  %v2135_v13 = vpop.permute.xlu1 %2134 }
 0x39b   :  { %2661 = vrot.lane.b32.xlu0 %v2660_v10, %s2733_s28  ;;  %2085 = vrot.lane.b32.xlu1 %v2075_v12, %s2727_s10  ;;  %v2690_v30 = vpack.i.bf16 %v1858_v27, %v1857_v15  ;;  %v1997_v21 = vsel %vm250_vm5, %v1991_v32, %v3452_v28  ;;  %v2005_v41 = vmul.f32 %v1996_v11, %v3462_v34  ;;  %v2079_v63 = vmul.f32 0.0, %v2066_v31 }
 0x39c   :  { %v2700_v5 = vpack.i.bf16 %v1937_v8, %v1936_v33  ;;  %v2685_v40 = vpack.i.bf16 %v1856_v20, %v1855_v3  ;;  %v1934_v35 = vmul.f32 %v1925_v23, %v3462_v34  ;;  %v1926_v51 = vsel %vm324_vm4, %v3446_v25, %v3444_v24  ;;  %v2137_v48 = vpop.permute.xlu0 %2136 }
 0x39d   :  { %v1998_v54 = vsel %vm250_vm5, %v3452_v28, %v1995_v49  ;;  %v2067_v4 = vsel %vm176_vm6, %v2060_v0, %v2062_v62  ;;  %v2006_v26 = vmul.f32 %v1997_v21, %v3450_v22  ;;  %v1935_v32 = vmul.f32 %v1926_v51, %v3450_v22 }
 0x39e   :  { %v2068_v44 = vsel %vm176_vm6, %v2062_v62, %v2064_v29  ;;  %v2076_v25 = vmul.f32 %v2067_v4, %v3462_v34  ;;  %v2007_v28 = vmul.f32 %v1998_v54, %v3454_v39  ;;  %v2069_v59 = vsel %vm176_vm6, %v2064_v29, %v2066_v31 }
 0x39f   :  { %2671 = vrot.lane.b32.xlu0 %v2670_v17, %s2732_s25  ;;  %2656 = vrot.lane.b32.xlu1 %v2655_v52, %s2733_s28  ;;  %v2705_v47 = vpack.i.bf16 %v2006_v26, %v2005_v41  ;;  %v2695_v24 = vpack.i.bf16 %v1935_v32, %v1934_v35  ;;  %v2077_v60 = vmul.f32 %v2068_v44, %v3450_v22  ;;  %v2150_v49 = vmul.f32 0.0, %v2137_v48  ;;  %v1652_v17 = vpop.permute.xlu1 %1651 }
 0x3a0   :  { %v2710_v56 = vpack.i.bf16 %v2008_v55, %v2007_v28  ;;  %v2078_v37 = vmul.f32 %v2069_v59, %v3454_v39  ;;  %v2138_v0 = vsel %vm102_vm7, %v2131_v45, %v2133_v1  ;;  %v2139_v10 = vsel %vm102_vm7, %v2133_v1, %v2135_v13  ;;  %v1723_v38 = vpop.permute.xlu0 %1722 }
 0x3a1   :  { %v2715_v6 = vpack.i.bf16 %v2077_v60, %v2076_v25  ;;  %v2147_v52 = vmul.f32 %v2138_v0, %v3462_v34  ;;  %v2140_v12 = vsel %vm102_vm7, %v2135_v13, %v2137_v48 }
 0x3a2   :  { %v2720_v2 = vpack.i.bf16 %v2079_v63, %v2078_v37  ;;  %v2149_v46 = vmul.f32 %v2140_v12, %v3454_v39 }
 0x3a3   :  { %2681 = vrot.lane.b32.xlu0 %v2680_v36, %s2731_s22  ;;  %2666 = vrot.lane.b32.xlu1 %v2665_v42, %s2732_s25  ;;  %v2148_v42 = vmul.f32 %v2139_v10, %v3450_v22  ;;  %v1794_v19 = vpop.permute.xlu1 %1793 }
 0x3a4   :  { %v1865_v61 = vpop.permute.xlu0 %1864 }
 0x3a7   :  { %2691 = vrot.lane.b32.xlu0 %v2690_v30, %s2730_s19  ;;  %2676 = vrot.lane.b32.xlu1 %v2675_v53, %s2731_s22  ;;  %v2146_v53 = vmul.f32 %v2131_v45, %v3458_v43 }
 0x3ab   :  { %2701 = vrot.lane.b32.xlu0 %v2700_v5, %s2729_s16  ;;  %2686 = vrot.lane.b32.xlu1 %v2685_v40, %s2730_s19 }
 0x3af   :  { %2706 = vrot.lane.b32.xlu0 %v2705_v47, %s2728_s13  ;;  %2696 = vrot.lane.b32.xlu1 %v2695_v24, %s2729_s16 }
 0x3b3   :  { %2716 = vrot.lane.b32.xlu0 %v2715_v6, %s2727_s10  ;;  %2711 = vrot.lane.b32.xlu1 %v2710_v56, %s2728_s13 }
 0x3b7   :  { %2158 = vrot.lane.b32.xlu0 %v2147_v52, %s2726_s29  ;;  %2721 = vrot.lane.b32.xlu1 %v2720_v2, %s2727_s10 }
 0x3bb   :  { %2162 = vrot.lane.b32.xlu0 %v2149_v46, %s2726_s29  ;;  %2160 = vrot.lane.b32.xlu1 %v2148_v42, %s2726_s29 }
 0x3bf   :  { %2156 = vrot.lane.b32.xlu0 %v2146_v53, %s2726_s29  ;;  %2164 = vrot.lane.b32.xlu1 %v2150_v49, %s2726_s29 }
 0x3c3   :  { %2216 = vperm.xlu1 %2725, %v1601_v16  }
 0x409   :  { %v3558_v62 = vpop.permute.xlu0 %2014  ;;  %v3560_v36 = vpop.permute.xlu1 %1943 }
 0x40d   :  { %v2662_v15 = vpop.permute.xlu0 %2661  ;;  %v3562_v27 = vpop.permute.xlu1 %2085 }
 0x40e   :  { %v2664_v50 = vunpack.i.h.bf16 %v2662_v15  ;;  %v2663_v18 = vunpack.i.l.bf16 %v2662_v15 }
 0x410   :  { %v1664_v29 = vsel %vm102_vm7, %v2663_v18, %v2664_v50 }
 0x411   :  { %v2672_v7 = vpop.permute.xlu0 %2671  ;;  %v2657_v8 = vpop.permute.xlu1 %2656 }
 0x412   :  { %v2674_v30 = vunpack.i.h.bf16 %v2672_v7  ;;  %v2673_v33 = vunpack.i.l.bf16 %v2672_v7  ;;  %v2659_v3 = vunpack.i.h.bf16 %v2657_v8  ;;  %v2658_v20 = vunpack.i.l.bf16 %v2657_v8 }
 0x414   :  { %v1735_v31 = vsel %vm176_vm6, %v2673_v33, %v2674_v30  ;;  %v1663_v41 = vsel %vm102_vm7, %v2659_v3, %v2663_v18  ;;  %v1661_v35 = vsel %vm102_vm7, %v1652_v17, %v2658_v20  ;;  %v1662_v54 = vsel %vm102_vm7, %v2658_v20, %v2659_v3 }
 0x415   :  { %v2682_v23 = vpop.permute.xlu0 %2681  ;;  %v2667_v11 = vpop.permute.xlu1 %2666  ;;  %v2488_v21 = vpack.c.bf16 %v1735_v31, %v1664_v29 }
 0x416   :  { %v2669_v5 = vunpack.i.h.bf16 %v2667_v11  ;;  %v2668_v40 = vunpack.i.l.bf16 %v2667_v11  ;;  %v2684_v51 = vunpack.i.h.bf16 %v2682_v23  ;;  %v2683_v4 = vunpack.i.l.bf16 %v2682_v23 }
 0x417   :  { %2489 = vmatprep.subr.bf16.mxu1 %v2488_v21 }
 0x418   :  { %v1734_v26 = vsel %vm176_vm6, %v2669_v5, %v2673_v33  ;;  %v1732_v32 = vsel %vm176_vm6, %v1723_v38, %v2668_v40  ;;  %v1733_v55 = vsel %vm176_vm6, %v2668_v40, %v2669_v5  ;;  %v1806_v63 = vsel %vm250_vm5, %v2683_v4, %v2684_v51 }
 0x419   :  { %v2474_v44 = vpack.c.bf16 %v1732_v32, %v1661_v35  ;;  %v2490_v45 = vpack.c.bf16 %v1734_v26, %v1663_v41  ;;  %v2692_v1 = vpop.permute.xlu0 %2691  ;;  %v2677_v47 = vpop.permute.xlu1 %2676  ;;  %v2472_v24 = vpack.c.bf16 %v1733_v55, %v1662_v54 }
 0x41a   :  { %v2694_v25 = vunpack.i.h.bf16 %v2692_v1  ;;  %v2693_v28 = vunpack.i.l.bf16 %v2692_v1  ;;  %v2679_v59 = vunpack.i.h.bf16 %v2677_v47  ;;  %v2678_v60 = vunpack.i.l.bf16 %v2677_v47 }
 0x41b   :  { %2473 = vmatprep.subr.bf16.mxu0 %v2472_v24  ;;  %2491 = vmatpush1.bf16.msra.mxu1 %v2490_v45 }
 0x41c   :  { %2475 = vmatpush1.bf16.msra.mxu0 %v2474_v44  ;;  %v1877_v6 = vsel %vm324_vm4, %v2693_v28, %v2694_v25  ;;  %v1805_v10 = vsel %vm250_vm5, %v2679_v59, %v2683_v4  ;;  %v1803_v12 = vsel %vm250_vm5, %v1794_v19, %v2678_v60  ;;  %v1804_v42 = vsel %vm250_vm5, %v2678_v60, %v2679_v59  ;;  %v1600_v60 = vld [vmem:[%s3631_s4] sm:$0xff] }
 0x41d   :  { %v2702_v56 = vpop.permute.xlu0 %2701  ;;  %v2687_v37 = vpop.permute.xlu1 %2686  ;;  %v2492_v0 = vpack.c.bf16 %v1877_v6, %v1806_v63 }
 0x41e   :  { %v2704_v13 = vunpack.i.h.bf16 %v2702_v56  ;;  %v2703_v48 = vunpack.i.l.bf16 %v2702_v56  ;;  %v2689_v52 = vunpack.i.h.bf16 %v2687_v37  ;;  %v2688_v2 = vunpack.i.l.bf16 %v2687_v37 }
 0x41f   :  { %2493 = vmatprep.subr.bf16.mxu1 %v2492_v0 }
 0x420   :  { %v1876_v46 = vsel %vm324_vm4, %v2689_v52, %v2693_v28  ;;  %v1874_v49 = vsel %vm324_vm4, %v1865_v61, %v2688_v2  ;;  %v1875_v53 = vsel %vm324_vm4, %v2688_v2, %v2689_v52  ;;  %v1956_v16 = vsel %vm295_vm3, %v2703_v48, %v2704_v13 }
 0x421   :  { %v2478_v17 = vpack.c.bf16 %v1874_v49, %v1803_v12  ;;  %v2494_v38 = vpack.c.bf16 %v1876_v46, %v1805_v10  ;;  %v2707_v15 = vpop.permute.xlu0 %2706  ;;  %v2697_v50 = vpop.permute.xlu1 %2696  ;;  %v2476_v18 = vpack.c.bf16 %v1875_v53, %v1804_v42  ;;  %v2496_v7 = vpack.c.bf16 %v1956_v16, %v3454_v39 }
 0x422   :  { %v2699_v8 = vunpack.i.h.bf16 %v2697_v50  ;;  %v2698_v19 = vunpack.i.l.bf16 %v2697_v50  ;;  %v2709_v30 = vunpack.i.h.bf16 %v2707_v15  ;;  %v2708_v33 = vunpack.i.l.bf16 %v2707_v15 }
 0x423   :  { %2477 = vmatprep.subr.bf16.mxu0 %v2476_v18  ;;  %2495 = vmatpush1.bf16.msra.mxu1 %v2494_v38 }
 0x424   :  { %v1955_v3 = vsel %vm295_vm3, %v2699_v8, %v2703_v48  ;;  %v1953_v61 = vsel %vm295_vm3, %v3560_v36, %v2698_v19  ;;  %2479 = vmatpush1.bf16.msra.mxu0 %v2478_v17  ;;  %2497 = vmatprep.subr.bf16.mxu1 %v2496_v7  ;;  %v1954_v23 = vsel %vm295_vm3, %v2698_v19, %v2699_v8 }
 0x425   :  { %v2498_v20 = vpack.c.bf16 %v1955_v3, %v3450_v22  ;;  %v2717_v29 = vpop.permute.xlu0 %2716  ;;  %v2712_v31 = vpop.permute.xlu1 %2711  ;;  %v2482_v39 = vpack.c.bf16 %v1953_v61, %v3458_v43  ;;  %v2480_v5 = vpack.c.bf16 %v1954_v23, %v3462_v34  ;;  %v2025_v40 = vsel %vm221_vm2, %v2708_v33, %v2709_v30 }
 0x426   :  { %v2719_v11 = vunpack.i.h.bf16 %v2717_v29  ;;  %v2718_v21 = vunpack.i.l.bf16 %v2717_v29  ;;  %v2714_v41 = vunpack.i.h.bf16 %v2712_v31  ;;  %v2713_v35 = vunpack.i.l.bf16 %v2712_v31 }
 0x427   :  { %2499 = vmatpush1.bf16.msra.mxu1 %v2498_v20  ;;  %v2024_v51 = vsel %vm221_vm2, %v3558_v62, %v2708_v33  ;;  %2481 = vmatprep.subr.bf16.mxu0 %v2480_v5 }
 0x428   :  { %v2095_v36 = vsel %vm147_vm1, %v3562_v27, %v2718_v21  ;;  %v2096_v22 = vsel %vm147_vm1, %v2718_v21, %v2719_v11  ;;  %2483 = vmatpush1.bf16.msra.mxu0 %v2482_v39  ;;  %v2026_v55 = vsel %vm221_vm2, %v2709_v30, %v2713_v35  ;;  %v2027_v44 = vsel %vm221_vm2, %v2713_v35, %v2714_v41 }
 0x429   :  { %v2159_v54 = vpop.permute.xlu0 %2158  ;;  %v2722_v43 = vpop.permute.xlu1 %2721  ;;  %v2484_v4 = vpack.c.bf16 %v2096_v22, %v2025_v40  ;;  %v2486_v26 = vpack.c.bf16 %v2095_v36, %v2024_v51 }
 0x42a   :  { %v2724_v34 = vunpack.i.h.bf16 %v2722_v43  ;;  %v2723_v32 = vunpack.i.l.bf16 %v2722_v43 }
 0x42b   :  { %2485 = vmatprep.subr.bf16.mxu0 %v2484_v4 }
 0x42c   :  { %v2097_v27 = vsel %vm147_vm1, %v2719_v11, %v2723_v32  ;;  %v2098_v45 = vsel %vm147_vm1, %v2723_v32, %v2724_v34  ;;  %2487 = vmatpush1.bf16.msra.mxu0 %v2486_v26 }
 0x42d   :  { %v2502_v1 = vpack.c.bf16 %v2097_v27, %v2026_v55  ;;  %v2163_v47 = vpop.permute.xlu0 %2162  ;;  %v2161_v62 = vpop.permute.xlu1 %2160  ;;  %v2500_v24 = vpack.c.bf16 %v2098_v45, %v2027_v44 }
 0x42e   :  { %v2167_v25 = vsel %vm73_vm0, %v2159_v54, %v2161_v62  ;;  %v2168_v56 = vsel %vm73_vm0, %v2161_v62, %v2163_v47 }
 0x42f   :  { %2238 = vmatprep.subr.mxu0 %v2167_v25  ;;  %2501 = vmatprep.subr.bf16.mxu1 %v2500_v24 }
 0x430   :  { %2503 = vmatpush1.bf16.msra.mxu1 %v2502_v1 }
 0x431   :  { %v2157_v28 = vpop.permute.xlu0 %2156  ;;  %v2165_v59 = vpop.permute.xlu1 %2164 }
 0x432   :  { %v2166_v63 = vsel %vm73_vm0, %v2157_v28, %v2159_v54  ;;  %v2169_v6 = vsel %vm73_vm0, %v2163_v47, %v2165_v59 }
 0x433   :  { %2239 = vmatpush1.msra.mxu0 %v2166_v63  ;;  %2309 = vmatprep.subr.mxu1 %v2169_v6 }
 0x434   :  { %2404 = vmatmul.mubr.msk.f32.vlgmr.msra.gmra.mrb[4].mxu0 %vm674_vm8, %v1600_v60  ;;  %2310 = vmatpush1.msra.mxu1 %v2168_v56 }
 0x435   :  { %2405 = vmatmul.mubr.msk.f32.vlgmr.msra.gmra.mrb[4].mxu1 %vm674_vm8, %v1600_v60 }
 0x442   :  { %v2217_v37 = vpop.permute.xlu1 %2216 }
 0x507   :  { %v2288_v0 = vpop.f32.mrb[4].mxu0 }
 0x508   :  { %v2289_v13 = vadd.f32 %v2288_v0, %v2217_v37  ;;  %v2290_v48 = vpop.f32.mrb[5].mxu0  ;;  %v2359_v52 = vpop.f32.mrb[4].mxu1 }
 0x509   :  { %v2291_v2 = vadd.f32 %v2290_v48, %v2217_v37  ;;  %v2360_v10 = vadd.f32 %v2359_v52, %v2217_v37  ;;  %v2361_v12 = vpop.f32.mrb[5].mxu1 }
 0x50a   :  { %v2364_v42 = vadd.f32 %v2289_v13, %v3183_v14  ;;  %v2362_v46 = vadd.f32 %v2361_v12, %v2217_v37 }
 0x50b   :  { %v2365_v49 = vadd.f32 %v2291_v2, %v3185_v58  ;;  %v2366_v53 = vadd.f32 %v2360_v10, %v3191_v57 }
 0x50c   :  { %2368 = vst [vmem:[%s3632_s8] sm:$0xff] %v2364_v42  ;;  %v2367_v16 = vadd.f32 %v2362_v46, %v3200_v9 }
 0x50d   :  { %2369 = vst [vmem:[%s3632_s8 + $0x8] sm:$0xff] %v2365_v49  ;;  %2406 = vst [vmem:[%s3632_s8 + $0x10] sm:$0xff] %v2366_v53 }
 0x50e   :  { %2407 = vst [vmem:[%s3632_s8 + $0x18] sm:$0xff] %v2367_v16 }

</bundles_post_ra>
